<compile_context>
chip_gen: v7x
topology: tpu7x:2x2x1
jax: 0.10.0
libtpu: 0.0.40
codegen_flags: <defaults>
</compile_context>

<pallas_src>
import functools

import jax
import jax.numpy as jnp
from jax.experimental import pallas as pl
from jax.experimental.pallas import tpu as pltpu


def _round_up(x, m):
    return ((x + m - 1) // m) * m


def _conv_stats_kernel(xp_ref, w_ref, y_ref, stat_ref, *, valid_h, padded_h):
    """3x3 conv as ONE im2col matmul per tile + per-tile partial BN statistics.

    xp_ref:   (1, Hp+2, W+2, Cin)  padded NHWC image of batch element n (VMEM)
    w_ref:    (9*Cin, Coutp)       weights, rows ordered (kh, kw, cin)
    y_ref:    (1, th, W, Coutp)    conv output tile (channels lane-dense)
    stat_ref: (1, 1, 2, Coutp)     row 0 = sum, row 1 = sum of squares
    """
    _, th, W, Coutp = y_ref.shape
    Cin = xp_ref.shape[-1]

    j = pl.program_id(1)
    h0 = pl.multiple_of(j * th, th)

    # Three kw-shifted windows: the kw slice is the sublane-unaligned (expensive)
    # one, so do it once per kw and reuse across the three kh taps.
    wins = [xp_ref[0, pl.ds(h0, th + 2), pl.ds(kw, W), :] for kw in range(3)]

    # im2col LHS with columns ordered (kh, kw, cin) to match the weight layout.
    patches = []
    for kh in range(3):
        for kw in range(3):
            patches.append(wins[kw][kh:kh + th].reshape(th * W, Cin))
    lhs = jnp.concatenate(patches, axis=-1)                     # (th*W, 9*Cin)

    # Single MXU contraction with K = 9*Cin (instead of 9 dots with K = Cin).
    acc = jnp.dot(lhs, w_ref[...], preferred_element_type=jnp.float32)
    y_ref[0] = acc.reshape(th, W, Coutp)

    # Per-tile partial statistics for training-mode BatchNorm.  If H was padded up
    # to Hp, rows >= H must not contribute (static check: no code when Hp == H).
    if padded_h != valid_h:
        row = h0 + jax.lax.broadcasted_iota(jnp.int32, (th * W, 1), 0) // W
        acc = acc * (row < valid_h).astype(jnp.float32)
    s = jnp.sum(acc, axis=0, keepdims=True)                     # (1, Coutp)
    ss = jnp.sum(acc * acc, axis=0, keepdims=True)              # (1, Coutp)
    stat_ref[0, 0] = jnp.concatenate([s, ss], axis=0)           # (2, Coutp)


def _bn_relu_kernel(y_ref, scale_ref, shift_ref, o_ref):
    """Normalize + affine + ReLU; store only the UNPADDED Cout channels."""
    cout = o_ref.shape[-1]
    r = jnp.maximum(y_ref[...] * scale_ref[...] + shift_ref[...], 0.0)
    o_ref[...] = r[..., :cout]


def _hw_budget():
    """(vmem_limit_bytes, per-tile output byte cap), generation-aware."""
    try:
        phys = getattr(pltpu.get_tpu_info(), "vmem_capacity_bytes",
                       128 * 1024 * 1024)
    except Exception:  # pragma: no cover - conservative fallback
        phys = 128 * 1024 * 1024
    if phys >= 128 * 1024 * 1024:              # v5e / v6e: 128 MiB physical VMEM
        return 64 * 1024 * 1024, 4 * 1024 * 1024
    return 48 * 1024 * 1024, 2 * 1024 * 1024    # v7x-class: 64 MiB physical VMEM


def _pick_h_tile(H, W, Coutp, tile_bytes_cap):
    """Largest row count whose (th, W, Coutp) f32 output tile stays under the cap.
    Does NOT require th | H (H is padded up to a multiple of th and masked)."""
    rows = max(1, tile_bytes_cap // (W * Coutp * 4))
    if rows >= H:
        return H
    return min(max(8, (rows // 8) * 8), H)


def single_conv_forward(x, w, b, gamma, beta, *, eps=1e-5):
    """x: (N, C_in, H, W) f32.  w: (C_out, C_in, 3, 3).  Returns (N, C_out, H, W)."""
    del b  # exactly cancelled by training-mode BN mean subtraction (see header note)
    N, Cin, H, W = x.shape
    Cout = w.shape[0]
    Coutp = _round_up(Cout, 128)               # lane-dense conv output channels

    vmem_limit, tile_cap = _hw_budget()
    th = _pick_h_tile(H, W, Coutp, tile_cap)
    num_h = pl.cdiv(H, th)
    Hp = num_h * th                            # padded row count (Hp == H when th | H)

    # --- XLA glue: NCHW -> NHWC + spatial zero pad (no HBM-side im2col) ---
    x_nhwc = jnp.transpose(x, (0, 2, 3, 1))
    xpad = jnp.pad(x_nhwc, ((0, 0), (1, 1 + Hp - H), (1, 1), (0, 0)))  # (N, Hp+2, W+2, Cin)

    # Weights: (Cout, Cin, 3, 3) -> (9*Cin, Coutp), rows ordered (kh, kw, cin).
    wmat = jnp.transpose(w, (2, 3, 1, 0)).reshape(9 * Cin, Cout)
    wmat = jnp.pad(wmat, ((0, 0), (0, Coutp - Cout)))

    # Single-buffer the per-batch padded image only when double-buffering it would
    # eat a significant chunk of the VMEM budget (its block index changes only with n).
    img_block_bytes = 4 * (Hp + 2) * _round_up(W + 2, 8) * _round_up(Cin, 128)
    img_shape = (1, Hp + 2, W + 2, Cin)
    img_index_map = lambda n, j: (n, 0, 0, 0)
    if 2 * img_block_bytes > vmem_limit // 4:
        img_spec = pl.BlockSpec(img_shape, img_index_map, pipeline_mode=pl.Buffered(1))
    else:
        img_spec = pl.BlockSpec(img_shape, img_index_map)

    conv_bytes = 4 * (N * (Hp + 2) * (W + 2) * Cin + 9 * Cin * Coutp
                      + N * Hp * W * Coutp + N * num_h * 2 * Coutp)

    # --- Pallas kernel 1: conv (one im2col matmul per tile) + partial BN stats ---
    y, partials = pl.pallas_call(
        functools.partial(_conv_stats_kernel, valid_h=H, padded_h=Hp),
        out_shape=(
            jax.ShapeDtypeStruct((N, Hp, W, Coutp), jnp.float32),
            jax.ShapeDtypeStruct((N, num_h, 2, Coutp), jnp.float32),
        ),
        grid=(N, num_h),   # batch is the leading parallel axis (megacore-friendly)
        in_specs=[
            img_spec,
            pl.BlockSpec((9 * Cin, Coutp), lambda n, j: (0, 0)),
        ],
        out_specs=(
            pl.BlockSpec((1, th, W, Coutp), lambda n, j: (n, j, 0, 0)),
            pl.BlockSpec((1, 1, 2, Coutp), lambda n, j: (n, j, 0, 0)),
        ),
        compiler_params=pltpu.CompilerParams(
            dimension_semantics=("parallel", "parallel"),
            vmem_limit_bytes=vmem_limit,
        ),
        cost_estimate=pl.CostEstimate(
            flops=int(2 * N * Hp * W * 9 * Cin * Coutp),
            transcendentals=0,
            bytes_accessed=int(conv_bytes),
        ),
    )(xpad, wmat)

    # --- finalize BN statistics on tiny (Coutp,) vectors (XLA) ---
    m = float(N * H * W)
    sums = jnp.sum(partials[:, :, 0, :], axis=(0, 1))
    sumsq = jnp.sum(partials[:, :, 1, :], axis=(0, 1))
    mean = sums / m
    var = jnp.maximum(sumsq / m - mean * mean, 0.0)   # biased (training-mode) variance
    inv_std = jax.lax.rsqrt(var + eps)
    gamma_p = jnp.pad(gamma.astype(jnp.float32), (0, Coutp - Cout))
    beta_p = jnp.pad(beta.astype(jnp.float32), (0, Coutp - Cout))
    scale = (gamma_p * inv_std).reshape(1, 1, 1, Coutp)
    shift = (beta_p - mean * gamma_p * inv_std).reshape(1, 1, 1, Coutp)

    # --- Pallas kernel 2: normalize + ReLU, writing the UNPADDED channel slab ---
    out_nhwc = pl.pallas_call(
        _bn_relu_kernel,
        out_shape=jax.ShapeDtypeStruct((N, Hp, W, Cout), jnp.float32),
        grid=(N, num_h),
        in_specs=[
            pl.BlockSpec((1, th, W, Coutp), lambda n, j: (n, j, 0, 0)),
            pl.BlockSpec((1, 1, 1, Coutp), lambda n, j: (0, 0, 0, 0)),
            pl.BlockSpec((1, 1, 1, Coutp), lambda n, j: (0, 0, 0, 0)),
        ],
        out_specs=pl.BlockSpec((1, th, W, Cout), lambda n, j: (n, j, 0, 0)),
        compiler_params=pltpu.CompilerParams(
            dimension_semantics=("parallel", "parallel"),
            vmem_limit_bytes=vmem_limit,
        ),
        cost_estimate=pl.CostEstimate(
            flops=int(3 * N * Hp * W * Coutp),
            transcendentals=0,
            bytes_accessed=int(4 * (N * Hp * W * (Coutp + Cout) + 2 * Coutp)),
        ),
    )(y, scale, shift)

    # --- XLA glue: drop row padding (if any), NHWC -> NCHW for the PyTorch interface ---
    if Hp != H:
        out_nhwc = out_nhwc[:, :H]
    return jnp.transpose(out_nhwc, (0, 3, 1, 2))


def _reference(x, w, b, gamma, beta, eps=1e-5):
    conv = jax.lax.conv_general_dilated(
        x, w, window_strides=(1, 1), padding="SAME",
        dimension_numbers=("NCHW", "OIHW", "NCHW"),
    ) + b.reshape(1, -1, 1, 1)
    mean = conv.mean(axis=(0, 2, 3), keepdims=True)
    var = conv.var(axis=(0, 2, 3), keepdims=True)
    yhat = (conv - mean) / jnp.sqrt(var + eps)
    return jnp.maximum(yhat * gamma.reshape(1, -1, 1, 1) + beta.reshape(1, -1, 1, 1), 0.0)


if __name__ == "__main__":
    N, Cin, Cout, H, W = 2, 4, 8, 16, 16

    key = jax.random.PRNGKey(0)
    kx, kw_, kb = jax.random.split(key, 3)
    x = jax.random.normal(kx, (N, Cin, H, W), dtype=jnp.float32)
    w = jax.random.normal(kw_, (Cout, Cin, 3, 3), dtype=jnp.float32) * 0.1
    b = jax.random.normal(kb, (Cout,), dtype=jnp.float32) * 0.1
    gamma = jnp.ones((Cout,), dtype=jnp.float32)   # PyTorch BatchNorm2d default weight
    beta = jnp.zeros((Cout,), dtype=jnp.float32)   # PyTorch BatchNorm2d default bias

    out = single_conv_forward(x, w, b, gamma, beta)
    out = jax.block_until_ready(out)

    ref = _reference(x, w, b, gamma, beta)
    assert out.shape == (N, Cout, H, W)
    max_err = float(jnp.max(jnp.abs(out - ref)))
    assert jnp.allclose(out, ref, atol=1e-4, rtol=1e-4), max_err

    print("KERNEL_OK")
</pallas_src>

<mosaic_0001>
module attributes {stable_mosaic.version = 11 : i64} {
  func.func @_conv_stats_kernel(%arg0: i32, %arg1: i32, %arg2: memref<1x18x18x4xf32, #tpu.memory_space<vmem>>, %arg3: memref<36x128xf32, #tpu.memory_space<vmem>>, %arg4: memref<1x16x16x128xf32, #tpu.memory_space<vmem>>, %arg5: memref<1x1x2x128xf32, #tpu.memory_space<vmem>>) attributes {dimension_semantics = [#tpu.dimension_semantics<parallel>, #tpu.dimension_semantics<parallel>], iteration_bounds = array<i64: 2, 1>, scalar_prefetch = 0 : i64, scratch_operands = 0 : i64, tpu.core_type = #tpu.core_type<tc>, window_params = [{transform_indices = @transform_0, window_bounds = array<i64: 1, 18, 18, 4>}, {pipeline_mode = #tpu.pipeline_mode<synchronous>, transform_indices = @transform_1, window_bounds = array<i64: 36, 128>}, {transform_indices = @transform_2, window_bounds = array<i64: 1, 16, 16, 128>}, {transform_indices = @transform_3, window_bounds = array<i64: 1, 1, 2, 128>}]} {
    %c16_i32 = arith.constant 16 : i32
    %0 = arith.muli %arg1, %c16_i32 : i32
    %1 = tpu.assume_multiple %0, 16 : i32
    %c0 = arith.constant 0 : index
    %2 = arith.index_cast %1 : i32 to index
    %c0_0 = arith.constant 0 : index
    %c0_1 = arith.constant 0 : index
    %3 = vector.load %arg2[%c0, %2, %c0_0, %c0_1] : memref<1x18x18x4xf32, #tpu.memory_space<vmem>>, vector<1x18x16x4xf32>
    %4 = vector.shape_cast %3 : vector<1x18x16x4xf32> to vector<18x16x4xf32>
    %c0_2 = arith.constant 0 : index
    %5 = arith.index_cast %1 : i32 to index
    %c1 = arith.constant 1 : index
    %c0_3 = arith.constant 0 : index
    %6 = vector.load %arg2[%c0_2, %5, %c1, %c0_3] : memref<1x18x18x4xf32, #tpu.memory_space<vmem>>, vector<1x18x16x4xf32>
    %7 = vector.shape_cast %6 : vector<1x18x16x4xf32> to vector<18x16x4xf32>
    %c0_4 = arith.constant 0 : index
    %8 = arith.index_cast %1 : i32 to index
    %c2 = arith.constant 2 : index
    %c0_5 = arith.constant 0 : index
    %9 = vector.load %arg2[%c0_4, %8, %c2, %c0_5] : memref<1x18x18x4xf32, #tpu.memory_space<vmem>>, vector<1x18x16x4xf32>
    %10 = vector.shape_cast %9 : vector<1x18x16x4xf32> to vector<18x16x4xf32>
    %11 = vector.extract_strided_slice %4 {offsets = [0, 0, 0], sizes = [16, 16, 4], strides = [1, 1, 1]} : vector<18x16x4xf32> to vector<16x16x4xf32>
    %12 = vector.shape_cast %11 : vector<16x16x4xf32> to vector<256x4xf32>
    %13 = vector.extract_strided_slice %7 {offsets = [0, 0, 0], sizes = [16, 16, 4], strides = [1, 1, 1]} : vector<18x16x4xf32> to vector<16x16x4xf32>
    %14 = vector.shape_cast %13 : vector<16x16x4xf32> to vector<256x4xf32>
    %15 = vector.extract_strided_slice %10 {offsets = [0, 0, 0], sizes = [16, 16, 4], strides = [1, 1, 1]} : vector<18x16x4xf32> to vector<16x16x4xf32>
    %16 = vector.shape_cast %15 : vector<16x16x4xf32> to vector<256x4xf32>
    %17 = vector.extract_strided_slice %4 {offsets = [1, 0, 0], sizes = [16, 16, 4], strides = [1, 1, 1]} : vector<18x16x4xf32> to vector<16x16x4xf32>
    %18 = vector.shape_cast %17 : vector<16x16x4xf32> to vector<256x4xf32>
    %19 = vector.extract_strided_slice %7 {offsets = [1, 0, 0], sizes = [16, 16, 4], strides = [1, 1, 1]} : vector<18x16x4xf32> to vector<16x16x4xf32>
    %20 = vector.shape_cast %19 : vector<16x16x4xf32> to vector<256x4xf32>
    %21 = vector.extract_strided_slice %10 {offsets = [1, 0, 0], sizes = [16, 16, 4], strides = [1, 1, 1]} : vector<18x16x4xf32> to vector<16x16x4xf32>
    %22 = vector.shape_cast %21 : vector<16x16x4xf32> to vector<256x4xf32>
    %23 = vector.extract_strided_slice %4 {offsets = [2, 0, 0], sizes = [16, 16, 4], strides = [1, 1, 1]} : vector<18x16x4xf32> to vector<16x16x4xf32>
    %24 = vector.shape_cast %23 : vector<16x16x4xf32> to vector<256x4xf32>
    %25 = vector.extract_strided_slice %7 {offsets = [2, 0, 0], sizes = [16, 16, 4], strides = [1, 1, 1]} : vector<18x16x4xf32> to vector<16x16x4xf32>
    %26 = vector.shape_cast %25 : vector<16x16x4xf32> to vector<256x4xf32>
    %27 = vector.extract_strided_slice %10 {offsets = [2, 0, 0], sizes = [16, 16, 4], strides = [1, 1, 1]} : vector<18x16x4xf32> to vector<16x16x4xf32>
    %28 = vector.shape_cast %27 : vector<16x16x4xf32> to vector<256x4xf32>
    %29 = tpu.concatenate %12, %14, %16, %18, %20, %22, %24, %26, %28 in 1 : vector<256x4xf32>, vector<256x4xf32>, vector<256x4xf32>, vector<256x4xf32>, vector<256x4xf32>, vector<256x4xf32>, vector<256x4xf32>, vector<256x4xf32>, vector<256x4xf32> -> vector<256x36xf32>
    %c0_6 = arith.constant 0 : index
    %c0_7 = arith.constant 0 : index
    %30 = vector.load %arg3[%c0_6, %c0_7] : memref<36x128xf32, #tpu.memory_space<vmem>>, vector<36x128xf32>
    %cst = arith.constant dense<0.000000e+00> : vector<256x128xf32>
    %31 = tpu.matmul %29, %30, %cst {dimension_numbers = #tpu.dot_dimension_numbers<[1], [0], [0], [1], [0, 0, 1, 1], [], []>} : vector<256x36xf32>, vector<36x128xf32>, vector<256x128xf32> -> vector<256x128xf32>
    %32 = vector.shape_cast %31 : vector<256x128xf32> to vector<16x16x128xf32>
    %c0_8 = arith.constant 0 : index
    %c0_9 = arith.constant 0 : index
    %c0_10 = arith.constant 0 : index
    %c0_11 = arith.constant 0 : index
    %33 = vector.load %arg4[%c0_8, %c0_9, %c0_10, %c0_11] : memref<1x16x16x128xf32, #tpu.memory_space<vmem>>, vector<1x16x16x128xf32>
    %34 = vector.shape_cast %33 : vector<1x16x16x128xf32> to vector<16x16x128xf32>
    %35 = vector.shape_cast %32 : vector<16x16x128xf32> to vector<1x16x16x128xf32>
    tpu.vector_store %arg4[%c0_8, %c0_9, %c0_10, %c0_11], %35 {strides = array<i32>} : memref<1x16x16x128xf32, #tpu.memory_space<vmem>>, vector<1x16x16x128xf32>,
    %cst_12 = arith.constant dense<0.000000e+00> : vector<128xf32>
    %36 = vector.multi_reduction <add>, %31, %cst_12 [0] : vector<256x128xf32> to vector<128xf32>
    %37 = vector.shape_cast %36 : vector<128xf32> to vector<1x128xf32>
    %38 = arith.mulf %31, %31 : vector<256x128xf32>
    %cst_13 = arith.constant dense<0.000000e+00> : vector<128xf32>
    %39 = vector.multi_reduction <add>, %38, %cst_13 [0] : vector<256x128xf32> to vector<128xf32>
    %40 = vector.shape_cast %39 : vector<128xf32> to vector<1x128xf32>
    %41 = tpu.concatenate %37, %40 in 0 : vector<1x128xf32>, vector<1x128xf32> -> vector<2x128xf32>
    %c0_14 = arith.constant 0 : index
    %c0_15 = arith.constant 0 : index
    %c0_16 = arith.constant 0 : index
    %c0_17 = arith.constant 0 : index
    %42 = vector.load %arg5[%c0_14, %c0_15, %c0_16, %c0_17] : memref<1x1x2x128xf32, #tpu.memory_space<vmem>>, vector<1x1x2x128xf32>
    %43 = vector.shape_cast %42 : vector<1x1x2x128xf32> to vector<2x128xf32>
    %44 = vector.shape_cast %41 : vector<2x128xf32> to vector<1x1x2x128xf32>
    tpu.vector_store %arg5[%c0_14, %c0_15, %c0_16, %c0_17], %44 {strides = array<i32>} : memref<1x1x2x128xf32, #tpu.memory_space<vmem>>, vector<1x1x2x128xf32>,
    return
  }
  func.func @transform_0(%arg0: i32, %arg1: i32) -> (i32, i32, i32, i32) {
    %c0_i32 = arith.constant 0 : i32
    %c0_i32_0 = arith.constant 0 : i32
    %c0_i32_1 = arith.constant 0 : i32
    %c0_i32_2 = arith.constant 0 : i32
    return %arg0, %c0_i32, %c0_i32_0, %c0_i32_1 : i32, i32, i32, i32
  }
  func.func @transform_1(%arg0: i32, %arg1: i32) -> (i32, i32) {
    %c0_i32 = arith.constant 0 : i32
    %c0_i32_0 = arith.constant 0 : i32
    %c0_i32_1 = arith.constant 0 : i32
    return %c0_i32, %c0_i32_0 : i32, i32
  }
  func.func @transform_2(%arg0: i32, %arg1: i32) -> (i32, i32, i32, i32) {
    %c0_i32 = arith.constant 0 : i32
    %c0_i32_0 = arith.constant 0 : i32
    %c0_i32_1 = arith.constant 0 : i32
    return %arg0, %arg1, %c0_i32, %c0_i32_0 : i32, i32, i32, i32
  }
  func.func @transform_3(%arg0: i32, %arg1: i32) -> (i32, i32, i32, i32) {
    %c0_i32 = arith.constant 0 : i32
    %c0_i32_0 = arith.constant 0 : i32
    %c0_i32_1 = arith.constant 0 : i32
    return %arg0, %arg1, %c0_i32, %c0_i32_0 : i32, i32, i32, i32
  }
}

</mosaic_0001>

<bundles_post_ra>
// kernel: tpu_custom_call.1
= control target key start
LH: loop header
LB: loop body
LE: loop exit
PB: predicated region body
PF: predicated region fallthrough
CT: control target
= control target key end

     0   :  { %9 = vsyncpa [#allocation3], 0  ;;  %s4159_s0 = inlined_call_operand.hbm [shape: f32[2,18,18,4], index: 0, kind: input, shape index: {}]   ;;  %s4160_s1 = inlined_call_operand.hbm [shape: f32[36,128], index: 1, kind: input, shape index: {}]   ;;  %s4161_s2 = inlined_call_operand.hbm [shape: f32[2,16,16,128], index: 2, kind: output, shape index: {0}]   ;;  %s4162_s3 = inlined_call_operand.hbm [shape: f32[2,1,2,128], index: 3, kind: output, shape index: {1}]  }
   0x1   :  { %11 = vsyncpa [#allocation3 + $0x1], 0 }
   0x2   :  { %12 = vsyncpa [#allocation6], 0 }
   0x3   :  { %13 = vsyncpa [#allocation4], 0 }
   0x4   :  { %15 = vsyncpa [#allocation4 + $0x1], 0 }
   0x5   :  { %16 = vsyncpa [#allocation9], 0 }
   0x6   :  { %18 = vsyncpa [#allocation9 + $0x1], 0  ;;  %s2600_s12 = smov 0   ;;  %s2602_s13 = smov 0  }
   0x7   :  { %s2604_s14 = smov 0   ;;  %s2606_s15 = smov 0  }
   0x8   :  { %s2608_s16 = smov 0   ;;  %s2610_s17 = smov 0  }
   0x9 LB: > { %s2118_s18 = sadd.s32 4294967295, %s2563_s17   ;;  %s2119_s19 = sadd.s32 4294967294, %s2563_s17   ;;  %s2563_s17 = sphi %s2610_s17, %s24_s17   ;;  %s2559_s16 = sphi %s2608_s16, %s4304_s16   ;;  %s2555_s15 = sphi %s2606_s15, %s4303_s15   ;;  %s2551_s14 = sphi %s2604_s14, %s4302_s14   ;;  %s2547_s13 = sphi %s2602_s13, %s4301_s13   ;;  %s2543_s12 = sphi %s2600_s12, %s4300_s12  }
   0xa   : > { %p56_p0 = scmp.ne.s32.totalorder %s2547_s13, %s2543_s12  ;;  %p2634_p1 = scmp.eq.s32.totalorder %s2118_s18, 0 }
   0xb   : > { %p2638_p2 = scmp.eq.s32.totalorder %s2118_s18, 1  ;;  %p109_p3 = scmp.eq.s32.totalorder %s2119_s19, 1 }
   0xc   : > { %s4204_s20 = scalar_select %p2634_p1, 1, 0 }
   0xd   : > { %s4205_s21 = scalar_select %p2638_p2, 1, 0 }
   0xe   : > { %p2644_p4 = por %p2634_p1, %p56_p0  ;;  %p2120_p5 = scmp.ge.s32.totalorder %s2563_s17, 1 }
   0xf   : > { %p2649_p6 = por %p109_p3, %p56_p0  ;;  %p144_p7 = scmp.lt.s32.totalorder %s2563_s17, 3 }
  0x10   : > { %s4206_s22 = scalar_select %p2644_p4, 1, 0 }
  0x11   : > { %s4207_s23 = scalar_select %p2649_p6, 1, 0 }
  0x12   : > { %p2654_p8 = pnand %p2120_p5, %p144_p7  ;;  %s2565_s25 = smov [#allocation5]  }
  0x13   : > { %s156_s26 = sshll.u32 %s2565_s25, 4  ;;  %s36_s28 = sadd.s32 1, %s2559_s16  ;;  %s157_s26 = int_to_ptr.vmem [resolvable:$true] %s156_s26 }
  0x14   : > { %s4208_s24 = scalar_select %p2654_p8, 1, 0 }
  0x15   : > { %p2291_p9 = pneg %p2654_p8  ;;  %s2387_s4 = scalar_lea.hbm %s4160_s1, 640 }
  0x16   : > { %p2388_p12 = scmp.ne.s32.totalorder %s4160_s1, %s2387_s4  ;;  %p2394_p5 = scmp.lt.u32.totalorder %s2387_s4, %s4160_s1 }
  0x17   : > { %p2663_p11 = pnand %p2291_p9, %p2634_p1 }
  0x19   : > { %p2389_p13 = pneg %p2663_p11 }
  0x1b   : > { %p2390_p0 = pnand %p2389_p13, %p2388_p12 }
  0x1d   : > { %p2391_p3 = pneg %p2390_p0 }
  0x1f   : > { %p2396_p7 = pnand %p2394_p5, %p2391_p3 }
  0x21   : > { %2399 = shalt.err (!%p2396_p7)
}
  0x22   : > { %s2400_s9 = scalar_lea.vmem %s157_s26, 640  ;;  %p2408_p1 = scmp.lt.s32.totalorder %s157_s26, %s157_s26 }
  0x23   : > { %p2401_p9 = scmp.ne.s32.totalorder %s157_s26, %s2400_s9  ;;  %p2409_p4 = scmp.lt.s32.totalorder %s2400_s9, %s2400_s9 }
  0x25   : > { %p2403_p10 = pnand %p2401_p9, %p2389_p13  ;;  %p2410_p8 = por %p2409_p4, %p2408_p1 }
  0x27   : > { %p2404_p6 = pneg %p2403_p10 }
  0x29   : > { %p2411_p2 = pnand %p2410_p8, %p2404_p6 }
  0x2b   : > { %2414 = shalt.err (!%p2411_p2)
}
  0x2c   : > { %s2566_s10 = smov 128   ;;  %s2567_s11 = smov 8  }
  0x2d   : > { %2294 = dma.hbm_to_vmem [thread:$0]  (!%p2663_p11), %s4160_s1, 640, %s157_s26, [#allocation6], %s2566_s10, %s2566_s10, %s2567_s11  }
  0x2e   : > { %p38_p1 = scmp.ge.s32.totalorder %s36_s28, 2  ;;  %s43_s25 = sadd.s32 1, %s2551_s14 }
  0x2f   : > { %p50_p2 = scmp.ne.s32.totalorder %s2551_s14, %s2547_s13  ;;  %p51_p4 = scmp.eq.s32.totalorder %s2563_s17, 0 }
  0x30   : > { %s4306_s28 = smov (%p38_p1, %s36_s28), 0  ;;  %p4210_p8 = scmp.ne.s32.totalorder %s4205_s21, 0 }
  0x31   : > { %p52_p6 = por %p51_p4, %p50_p2  ;;  %s40_s27 = ssub.s32 %s2559_s16, %s4306_s28 }
  0x32   : > { %p2695_p10 = por %p4210_p8, %p50_p2  ;;  %p2307_p12 = scmp.lt.s32.totalorder %s2563_s17, 2 }
  0x33   : > { %p41_p13 = scmp.eq.s32.totalorder %s40_s27, 0  ;;  %s170_s30 = sand.u32 1, %s2551_s14  }
  0x34   : > { %s2278_s4 = smul.u32 432, %s170_s30  ;;  %p2707_p11 = pnand %p2307_p12, %p52_p6 }
  0x35   : > { %s2704_s5 = scalar_select %p41_p13, %s2551_s14, %s43_s25  }
  0x36   : > { %s2279_s26 = smul.u32 6912, %s2559_s16  ;;  %s174_s6 = scalar_lea.vmem [#allocation2], %s2278_s4 }
  0x37   : > { %s181_s7 = sshll.u32 %s174_s6, 4  ;;  %s2718_s19 = scalar_lea.sflag [#allocation3], %s170_s30  ;;  %s2716_s7 = int_to_ptr.vmem [resolvable:$true] %s181_s7 }
  0x38   : > { %s2714_s18 = scalar_lea.hbm %s4159_s0, %s2279_s26  ;;  %p2417_p3 = pneg %p2707_p11 }
  0x39   : > { %s2415_s25 = scalar_lea.hbm %s2714_s18, 6912  ;;  %s2420_s26 = scalar_lea.hbm %s4159_s0, 13824 }
  0x3a   : > { %p2416_p0 = scmp.ne.s32.totalorder %s2714_s18, %s2415_s25  ;;  %p2421_p9 = scmp.lt.u32.totalorder %s2714_s18, %s4159_s0 }
  0x3b   : > { %p2422_p1 = scmp.lt.u32.totalorder %s2420_s26, %s2415_s25  ;;  %p2424_p4 = scmp.lt.u32.totalorder %s2415_s25, %s2714_s18 }
  0x3c   : > { %p2418_p5 = pnand %p2417_p3, %p2416_p0 }
  0x3d   : > { %p2423_p2 = por %p2422_p1, %p2421_p9 }
  0x3e   : > { %p2419_p7 = pneg %p2418_p5 }
  0x3f   : > { %p2425_p6 = por %p2424_p4, %p2423_p2 }
  0x41   : > { %p2426_p8 = pnand %p2425_p6, %p2419_p7 }
  0x43   : > { %2429 = shalt.err (!%p2426_p8)
}
  0x44   : > { %s2430_s30 = scalar_lea.vmem %s2716_s7, 6912  ;;  %s2568_s21 = smov [#allocation2]  }
  0x45   : > { %p2431_p12 = scmp.ne.s32.totalorder %s2716_s7, %s2430_s30  ;;  %s2435_s27 = sshll.u32 %s2568_s21, 4  ;;  %s2436_s27 = int_to_ptr.vmem [resolvable:$false] %s2435_s27 }
  0x46   : > { %s2437_s4 = scalar_lea.vmem %s2436_s27, 13824  ;;  %p2438_p5 = scmp.lt.s32.totalorder %s2716_s7, %s2436_s27 }
  0x47   : > { %p2433_p13 = pnand %p2431_p12, %p2417_p3  ;;  %p2439_p9 = scmp.lt.s32.totalorder %s2437_s4, %s2430_s30 }
  0x49   : > { %p2434_p0 = pneg %p2433_p13  ;;  %p2440_p1 = por %p2439_p9, %p2438_p5 }
  0x4b   : > { %p2441_p2 = pnand %p2440_p1, %p2434_p0 }
  0x4d   : > { %2444 = shalt.err (!%p2441_p2)
}
  0x4e   : > { %2298 = dma.hbm_to_vmem [thread:$0]  (!%p2707_p11), %s2714_s18, 6912, %s2716_s7, %s2718_s19, %s2566_s10, %s2566_s10, %s2567_s11  }
  0x4f   : > { %p4213_p3 = scmp.ne.s32.totalorder %s4208_s24, 0 }
  0x51   : > { %193 = sbr.rel (%p4213_p3) target bundleno = 979 (0x3d3), region = 28 }
  0x58   : > { %s2752_s25 = sand.u32 1, %s2547_s13   ;;  %p4214_p7 = scmp.ne.s32.totalorder %s4206_s22, 0 }
  0x59   : > { %s2280_s26 = smul.u32 432, %s2752_s25  ;;  %s196_s6 = scalar_lea.sflag [#allocation3], %s2752_s25 }
  0x5b   : > { %s2756_s9 = scalar_lea.vmem [#allocation2], %s2280_s26 }
  0x5c   : > { %2526 = dma.done.wait (%p4214_p7), %s196_s6, 6912  }
  0x5d   : > { %2528 = vsyncadd (%p4214_p7), %s196_s6, 4294960384  ;;  %p4215_p11 = scmp.ne.s32.totalorder %s4204_s20, 0 }
  0x5f   : > { %2530 = dma.done.wait (%p4215_p11), [#allocation6], 640  }
  0x60   : > { %2532 = vsyncadd (%p4215_p11), [#allocation6], 4294966656  ;;  %v2767_v0 = vld [vmem:[%s2756_s9 + $0x19] sm:$0xff]  ;;  %v271_v1 = vld [vmem:[%s2756_s9 + $0x1] sm:$0xff]  ;;  %s2569_s22 = smov 4   ;;  %s2570_s20 = smov 8  }
  0x61   : > { %379 = vrot.lane.b32.xlu1 %v2767_v0, %s2569_s22  ;;  %375 = vrot.lane.b32.xlu0 %v271_v1, %s2569_s22  ;;  %v2774_v2 = vld [vmem:[%s2756_s9 + $0x21] sm:$0xff]  ;;  %v272_v3 = vld [vmem:[%s2756_s9 + $0x9] sm:$0xff]  ;;  %vm1217_vm0 = vcmask 31744   ;;  %s2571_s24 = smov 12   ;;  %s2572_s10 = smov 16   ;;  %vm1583_vm1 = vcmask 1043456  }
  0x62   : > { %v2781_v4 = vld [vmem:[%s2756_s9 + $0x39] sm:$0xff]  ;;  %v2784_v5 = vld [vmem:[%s2756_s9 + $0x31] sm:$0xff]  ;;  %v2794_v7 = vld [vmem:[%s2756_s9 + $0x49] sm:$0xff]  ;;  %s2573_s11 = smov 20   ;;  %s2574_s7 = smov 24   ;;  %vm1250_vm2 = vcmask 64512  }
  0x63   : > { %v2791_v6 = vld [vmem:[%s2756_s9 + $0x51] sm:$0xff]  ;;  %v2801_v8 = vld [vmem:[%s2756_s9 + $0x69] sm:$0xff]  ;;  %v2804_v9 = vld [vmem:[%s2756_s9 + $0x61] sm:$0xff]  ;;  %s2575_s8 = smov 28   ;;  %s2576_s18 = smov 32   ;;  %vm1283_vm3 = vcmask 97280  }
  0x64   : > { %v2811_v10 = vld [vmem:[%s2756_s9 + $0x81] sm:$0xff]  ;;  %v2814_v11 = vld [vmem:[%s2756_s9 + $0x79] sm:$0xff]  ;;  %v2824_v13 = vld [vmem:[%s2756_s9 + $0x91] sm:$0xff]  ;;  %vm1316_vm4 = vcmask 130048   ;;  %vm1349_vm5 = vcmask 162816   ;;  %vm1382_vm6 = vcmask 195584  }
  0x65   : > { %381 = vrot.lane.b32.xlu1 %v2774_v2, %s2569_s22  ;;  %377 = vrot.lane.b32.xlu0 %v272_v3, %s2569_s22  ;;  %v2821_v12 = vld [vmem:[%s2756_s9 + $0x99] sm:$0xff]  ;;  %v2831_v14 = vld [vmem:[%s2756_s9 + $0xb1] sm:$0xff]  ;;  %vm1415_vm7 = vcmask 228352   ;;  %vm1448_vm8 = vcmask 261120   ;;  %vm1486_vm9 = vcmask 293888   ;;  %s2126_s19 = sshll.u32 %s2752_s25, 8 }
  0x66   : > { %v2834_v15 = vld [vmem:[%s2756_s9 + $0xa9] sm:$0xff]  ;;  %v2844_v17 = vld [vmem:[%s2756_s9 + $0xc1] sm:$0xff]  ;;  %v2854_v19 = vld [vmem:[%s2756_s9 + $0xd9] sm:$0xff]  ;;  %s3947_s30 = scalar_lea.vmem [#allocation7], %s2126_s19  ;;  %s2168_s21 = sshll.u32 %s2555_s15, 12 }
  0x67   : > { %v2841_v16 = vld [vmem:[%s2756_s9 + $0xc9] sm:$0xff]  ;;  %4217 = vst [vmem:[#allocation15_spill] sm:$0xff] %v2844_v17  ;;  %v2851_v18 = vld [vmem:[%s2756_s9 + $0xe1] sm:$0xff]  ;;  %4219 = vst [vmem:[#allocation17_spill] sm:$0xff] %v2854_v19  ;;  %s1975_s27 = sshll.u32 %s3947_s30, 4  ;;  %s4074_s6 = scalar_lea.hbm %s4161_s2, %s2168_s21  ;;  %s4076_s27 = int_to_ptr.vmem [resolvable:$true] %s1975_s27 }
  0x68   : > { %4216 = vst [vmem:[#allocation14_spill] sm:$0xff] %v2841_v16  ;;  %4218 = vst [vmem:[#allocation16_spill] sm:$0xff] %v2851_v18  ;;  %v2861_v20 = vld [vmem:[%s2756_s9 + $0xf9] sm:$0xff]  ;;  %v2864_v21 = vld [vmem:[%s2756_s9 + $0xf1] sm:$0xff] }
  0x69   : > { %385 = vrot.lane.b32.xlu1 %v2781_v4, %s2569_s22  ;;  %383 = vrot.lane.b32.xlu0 %v2784_v5, %s2569_s22  ;;  %4220 = vst [vmem:[#allocation18_spill] sm:$0xff] %v2861_v20  ;;  %4221 = vst [vmem:[#allocation19_spill] sm:$0xff] %v2864_v21  ;;  %v294_v22 = vld [vmem:[%s2756_s9 + $0x111] sm:$0xff]  ;;  %v2872_v23 = vld [vmem:[%s2756_s9 + $0x109] sm:$0xff] }
  0x6a   : > { %4222 = vst [vmem:[#allocation20_spill] sm:$0xff] %v2872_v23  ;;  %v296_v24 = vld [vmem:[%s2756_s9 + $0x129] sm:$0xff]  ;;  %v295_v25 = vld [vmem:[%s2756_s9 + $0x121] sm:$0xff]  ;;  %v297_v27 = vld [vmem:[%s2756_s9 + $0x139] sm:$0xff] }
  0x6b   : > { %v298_v26 = vld [vmem:[%s2756_s9 + $0x141] sm:$0xff]  ;;  %v300_v28 = vld [vmem:[%s2756_s9 + $0x159] sm:$0xff]  ;;  %v299_v29 = vld [vmem:[%s2756_s9 + $0x151] sm:$0xff] }
  0x6c   : > { %v302_v30 = vld [vmem:[%s2756_s9 + $0x171] sm:$0xff]  ;;  %v301_v31 = vld [vmem:[%s2756_s9 + $0x169] sm:$0xff]  ;;  %v2901_v35 = vld [vmem:[%s2756_s9 + $0x1a] sm:$0xff] }
  0x6d   : > { %389 = vrot.lane.b32.xlu1 %v2791_v6, %s2569_s22  ;;  %387 = vrot.lane.b32.xlu0 %v2794_v7, %s2569_s22  ;;  %v308_v32 = vld [vmem:[%s2756_s9 + $0xa] sm:$0xff]  ;;  %v307_v33 = vld [vmem:[%s2756_s9 + $0x2] sm:$0xff] }
  0x6e   : > { %v2898_v34 = vld [vmem:[%s2756_s9 + $0x22] sm:$0xff]  ;;  %v2908_v36 = vld [vmem:[%s2756_s9 + $0x3a] sm:$0xff]  ;;  %v2911_v37 = vld [vmem:[%s2756_s9 + $0x32] sm:$0xff] }
  0x6f   : > { %v2918_v38 = vld [vmem:[%s2756_s9 + $0x52] sm:$0xff]  ;;  %v2921_v39 = vld [vmem:[%s2756_s9 + $0x4a] sm:$0xff]  ;;  %v2931_v41 = vld [vmem:[%s2756_s9 + $0x62] sm:$0xff] }
  0x70   : > { %v2928_v40 = vld [vmem:[%s2756_s9 + $0x6a] sm:$0xff]  ;;  %v2938_v42 = vld [vmem:[%s2756_s9 + $0x82] sm:$0xff]  ;;  %v2941_v43 = vld [vmem:[%s2756_s9 + $0x7a] sm:$0xff] }
  0x71   : > { %393 = vrot.lane.b32.xlu1 %v2801_v8, %s2569_s22  ;;  %391 = vrot.lane.b32.xlu0 %v2804_v9, %s2569_s22  ;;  %v2948_v44 = vld [vmem:[%s2756_s9 + $0x9a] sm:$0xff]  ;;  %v2951_v45 = vld [vmem:[%s2756_s9 + $0x92] sm:$0xff] }
  0x72   : > { %v2958_v46 = vld [vmem:[%s2756_s9 + $0xb2] sm:$0xff]  ;;  %v2961_v47 = vld [vmem:[%s2756_s9 + $0xaa] sm:$0xff]  ;;  %v2971_v49 = vld [vmem:[%s2756_s9 + $0xc2] sm:$0xff] }
  0x73   : > { %v2968_v48 = vld [vmem:[%s2756_s9 + $0xca] sm:$0xff]  ;;  %4224 = vst [vmem:[#allocation22_spill] sm:$0xff] %v2971_v49  ;;  %v2978_v50 = vld [vmem:[%s2756_s9 + $0xe2] sm:$0xff]  ;;  %v2981_v51 = vld [vmem:[%s2756_s9 + $0xda] sm:$0xff] }
  0x74   : > { %4223 = vst [vmem:[#allocation21_spill] sm:$0xff] %v2968_v48  ;;  %4225 = vst [vmem:[#allocation23_spill] sm:$0xff] %v2978_v50  ;;  %v2988_v52 = vld [vmem:[%s2756_s9 + $0xfa] sm:$0xff]  ;;  %v2991_v53 = vld [vmem:[%s2756_s9 + $0xf2] sm:$0xff] }
  0x75   : > { %397 = vrot.lane.b32.xlu1 %v2811_v10, %s2569_s22  ;;  %395 = vrot.lane.b32.xlu0 %v2814_v11, %s2569_s22  ;;  %4226 = vst [vmem:[#allocation24_spill] sm:$0xff] %v2981_v51  ;;  %4227 = vst [vmem:[#allocation25_spill] sm:$0xff] %v2988_v52  ;;  %v2998_v54 = vld [vmem:[%s2756_s9 + $0x112] sm:$0xff]  ;;  %v3001_v55 = vld [vmem:[%s2756_s9 + $0x10a] sm:$0xff] }
  0x76   : > { %4228 = vst [vmem:[#allocation26_spill] sm:$0xff] %v2991_v53  ;;  %4229 = vst [vmem:[#allocation27_spill] sm:$0xff] %v2998_v54  ;;  %v3008_v56 = vld [vmem:[%s2756_s9 + $0x12a] sm:$0xff]  ;;  %v3011_v57 = vld [vmem:[%s2756_s9 + $0x122] sm:$0xff] }
  0x77   : > { %4230 = vst [vmem:[#allocation28_spill] sm:$0xff] %v3001_v55  ;;  %4231 = vst [vmem:[#allocation29_spill] sm:$0xff] %v3008_v56  ;;  %v334_v58 = vld [vmem:[%s2756_s9 + $0x142] sm:$0xff]  ;;  %v333_v59 = vld [vmem:[%s2756_s9 + $0x13a] sm:$0xff] }
  0x78   : > { %4232 = vst [vmem:[#allocation30_spill] sm:$0xff] %v3011_v57  ;;  %v336_v62 = vld [vmem:[%s2756_s9 + $0x15a] sm:$0xff]  ;;  %v335_v63 = vld [vmem:[%s2756_s9 + $0x152] sm:$0xff] }
  0x79   : > { %401 = vrot.lane.b32.xlu1 %v2821_v12, %s2569_s22  ;;  %399 = vrot.lane.b32.xlu0 %v2824_v13, %s2569_s22 }
  0x7d   : > { %405 = vrot.lane.b32.xlu1 %v2831_v14, %s2569_s22  ;;  %403 = vrot.lane.b32.xlu0 %v2834_v15, %s2569_s22 }
  0x81   : > { %409 = vrot.lane.b32.xlu1 %v2841_v16, %s2569_s22  ;;  %407 = vrot.lane.b32.xlu0 %v2844_v17, %s2569_s22 }
  0x85   : > { %413 = vrot.lane.b32.xlu1 %v2851_v18, %s2569_s22  ;;  %411 = vrot.lane.b32.xlu0 %v2854_v19, %s2569_s22 }
  0x89   : > { %417 = vrot.lane.b32.xlu1 %v2861_v20, %s2569_s22  ;;  %415 = vrot.lane.b32.xlu0 %v2864_v21, %s2569_s22  ;;  %v3107_v20 = vld [vmem:[%s2756_s9 + $0x78] sm:$0xff] }
  0x8a   : > { %v3118_v21 = vld [vmem:[%s2756_s9 + $0x98] sm:$0xff] }
  0x8d   : > { %421 = vrot.lane.b32.xlu1 %v294_v22, %s2569_s22  ;;  %419 = vrot.lane.b32.xlu0 %v2872_v23, %s2569_s22  ;;  %v338_v22 = vld [vmem:[%s2756_s9 + $0x172] sm:$0xff] }
  0x91   : > { %425 = vrot.lane.b32.xlu1 %v296_v24, %s2569_s22  ;;  %423 = vrot.lane.b32.xlu0 %v295_v25, %s2569_s22  ;;  %v337_v24 = vld [vmem:[%s2756_s9 + $0x16a] sm:$0xff] }
  0x95   : > { %429 = vrot.lane.b32.xlu1 %v298_v26, %s2569_s22  ;;  %427 = vrot.lane.b32.xlu0 %v297_v27, %s2569_s22  ;;  %v3042_v27 = vld [vmem:[%s2756_s9 + $0x50] sm:$0xff] }
  0x99   : > { %433 = vrot.lane.b32.xlu1 %v300_v28, %s2569_s22  ;;  %431 = vrot.lane.b32.xlu0 %v299_v29, %s2569_s22 }
  0x9d   : > { %437 = vrot.lane.b32.xlu1 %v302_v30, %s2569_s22  ;;  %435 = vrot.lane.b32.xlu0 %v301_v31, %s2569_s22  ;;  %v3047_v30 = vld [vmem:[%s2756_s9 + $0x18] sm:$0xff]  ;;  %v3050_v31 = vld [vmem:[%s2756_s9 + $0x20] sm:$0xff]  ;;  %s2445_s22 = scalar_lea.vmem %s4076_s27, 4096 }
  0x9e   : > { %4238 = vst [vmem:[#allocation36_spill] sm:$0xff] %v3047_v30  ;;  %4239 = vst [vmem:[#allocation37_spill] sm:$0xff] %v3050_v31  ;;  %p2446_p4 = scmp.ne.s32.totalorder %s4076_s27, %s2445_s22 }
  0xa0   : > { %p2447_p6 = pnand %p2446_p4, %p2695_p10 }
  0xa1   : > { %505 = vrot.lane.b32.xlu1 %v308_v32, %s2570_s20  ;;  %503 = vrot.lane.b32.xlu0 %v307_v33, %s2570_s20 }
  0xa2   : > { %p2448_p8 = pneg %p2447_p6 }
  0xa5   : > { %509 = vrot.lane.b32.xlu1 %v2898_v34, %s2570_s20  ;;  %507 = vrot.lane.b32.xlu0 %v2901_v35, %s2570_s20 }
  0xa9   : > { %513 = vrot.lane.b32.xlu1 %v2908_v36, %s2570_s20  ;;  %511 = vrot.lane.b32.xlu0 %v2911_v37, %s2570_s20 }
  0xad   : > { %517 = vrot.lane.b32.xlu1 %v2918_v38, %s2570_s20  ;;  %515 = vrot.lane.b32.xlu0 %v2921_v39, %s2570_s20 }
  0xb1   : > { %521 = vrot.lane.b32.xlu1 %v2928_v40, %s2570_s20  ;;  %519 = vrot.lane.b32.xlu0 %v2931_v41, %s2570_s20 }
  0xb5   : > { %525 = vrot.lane.b32.xlu1 %v2938_v42, %s2570_s20  ;;  %523 = vrot.lane.b32.xlu0 %v2941_v43, %s2570_s20 }
  0xb9   : > { %529 = vrot.lane.b32.xlu1 %v2948_v44, %s2570_s20  ;;  %527 = vrot.lane.b32.xlu0 %v2951_v45, %s2570_s20 }
  0xbd   : > { %533 = vrot.lane.b32.xlu1 %v2958_v46, %s2570_s20  ;;  %531 = vrot.lane.b32.xlu0 %v2961_v47, %s2570_s20 }
  0xc1   : > { %537 = vrot.lane.b32.xlu1 %v2968_v48, %s2570_s20  ;;  %535 = vrot.lane.b32.xlu0 %v2971_v49, %s2570_s20  ;;  %v1482_v48 = vld [vmem:[#allocation5 + $0x8] sm:$0xff]  ;;  %v1484_v49 = vld [vmem:[#allocation5 + $0x18] sm:$0xff] }
  0xc5   : > { %541 = vrot.lane.b32.xlu1 %v2978_v50, %s2570_s20  ;;  %539 = vrot.lane.b32.xlu0 %v2981_v51, %s2570_s20  ;;  %v3121_v50 = vld [vmem:[%s2756_s9 + $0x90] sm:$0xff] }
  0xc6   : > { %v3132_v51 = vld [vmem:[%s2756_s9 + $0xb0] sm:$0xff] }
  0xc9   : > { %545 = vrot.lane.b32.xlu1 %v2988_v52, %s2570_s20  ;;  %543 = vrot.lane.b32.xlu0 %v2991_v53, %s2570_s20  ;;  %v3104_v52 = vld [vmem:[%s2756_s9 + $0x80] sm:$0xff] }
  0xcd   : > { %549 = vrot.lane.b32.xlu1 %v2998_v54, %s2570_s20  ;;  %547 = vrot.lane.b32.xlu0 %v3001_v55, %s2570_s20  ;;  %v3093_v54 = vld [vmem:[%s2756_s9 + $0x60] sm:$0xff] }
  0xd1   : > { %553 = vrot.lane.b32.xlu1 %v3008_v56, %s2570_s20  ;;  %551 = vrot.lane.b32.xlu0 %v3011_v57, %s2570_s20  ;;  %v3090_v57 = vld [vmem:[%s2756_s9 + $0x68] sm:$0xff] }
  0xd3   : > { %v3019_v60 = vpop.permute.xlu1 %379  ;;  %v3021_v61 = vpop.permute.xlu0 %375 }
  0xd4   : > { %4233 = vst [vmem:[#allocation31_spill] sm:$0xff] %v3019_v60 }
  0xd5   : > { %557 = vrot.lane.b32.xlu1 %v334_v58, %s2570_s20  ;;  %555 = vrot.lane.b32.xlu0 %v333_v59, %s2570_s20  ;;  %v3065_v59 = vld [vmem:[%s2756_s9 + $0x38] sm:$0xff] }
  0xd6   : > { %4240 = vst [vmem:[#allocation38_spill] sm:$0xff] %v3065_v59 }
  0xd7   : > { %v3027_v1 = vpop.permute.xlu1 %381  ;;  %v3029_v3 = vpop.permute.xlu0 %377 }
  0xd8   : > { %4234 = vst [vmem:[#allocation32_spill] sm:$0xff] %v3027_v1  ;;  %v1481_v1 = vld [vmem:[#allocation5] sm:$0xff] }
  0xd9   : > { %561 = vrot.lane.b32.xlu1 %v336_v62, %s2570_s20  ;;  %559 = vrot.lane.b32.xlu0 %v335_v63, %s2570_s20  ;;  %v3068_v62 = vld [vmem:[%s2756_s9 + $0x30] sm:$0xff] }
  0xda   : > { %4241 = vst [vmem:[#allocation39_spill] sm:$0xff] %v3068_v62 }
  0xdb   : > { %v3035_v25 = vpop.permute.xlu1 %385  ;;  %v3037_v26 = vpop.permute.xlu0 %383 }
  0xdc   : > { %4235 = vst [vmem:[#allocation33_spill] sm:$0xff] %v3035_v25  ;;  %4236 = vst [vmem:[#allocation34_spill] sm:$0xff] %v3037_v26  ;;  %v3135_v26 = vld [vmem:[%s2756_s9 + $0xa8] sm:$0xff] }
  0xdd   : > { %565 = vrot.lane.b32.xlu1 %v338_v22, %s2570_s20  ;;  %563 = vrot.lane.b32.xlu0 %v337_v24, %s2570_s20  ;;  %v3079_v24 = vld [vmem:[%s2756_s9 + $0x48] sm:$0xff] }
  0xde   : > { %4242 = vst [vmem:[#allocation40_spill] sm:$0xff] %v3079_v24 }
  0xdf   : > { %v390_v28 = vpop.permute.xlu1 %389  ;;  %v3044_v29 = vpop.permute.xlu0 %387 }
  0xe0   : > { %4237 = vst [vmem:[#allocation35_spill] sm:$0xff] %v3044_v29  ;;  %v3054_v32 = vsel %vm1217_vm0, %v3042_v27, %v390_v28 }
  0xe1   : > { %633 = vrot.lane.b32.xlu1 %v3050_v31, %s2571_s24  ;;  %631 = vrot.lane.b32.xlu0 %v3047_v30, %s2571_s24  ;;  %v2264_v30 = vpack.c.bf16 %v1482_v48, %v1481_v1 }
  0xe3   : > { %v3060_v33 = vpop.permute.xlu1 %393  ;;  %v3062_v58 = vpop.permute.xlu0 %391  ;;  %2265 = vmatprep.subr.bf16.mxu0 %v2264_v30  ;;  %2272 = vmatprep.subr.bf16.mxu1 %v2264_v30 }
  0xe4   : > { %2267 = vmatpush3.bf16.msra.mxu0 %v2264_v30  ;;  %2275 = vmatpush3.bf16.msra.mxu1 %v2264_v30 }
  0xe5   : > { %637 = vrot.lane.b32.xlu1 %v3065_v59, %s2571_s24  ;;  %635 = vrot.lane.b32.xlu0 %v3068_v62, %s2571_s24 }
  0xe7   : > { %v3074_v63 = vpop.permute.xlu1 %397  ;;  %v3076_v22 = vpop.permute.xlu0 %395 }
  0xe9   : > { %641 = vrot.lane.b32.xlu1 %v3042_v27, %s2571_s24  ;;  %639 = vrot.lane.b32.xlu0 %v3079_v24, %s2571_s24 }
  0xeb   : > { %v3085_v28 = vpop.permute.xlu1 %401  ;;  %v3087_v56 = vpop.permute.xlu0 %399 }
  0xed   : > { %645 = vrot.lane.b32.xlu1 %v3090_v57, %s2571_s24  ;;  %643 = vrot.lane.b32.xlu0 %v3093_v54, %s2571_s24 }
  0xef   : > { %v3099_v55 = vpop.permute.xlu1 %405  ;;  %v3101_v23 = vpop.permute.xlu0 %403 }
  0xf1   : > { %649 = vrot.lane.b32.xlu1 %v3104_v52, %s2571_s24  ;;  %647 = vrot.lane.b32.xlu0 %v3107_v20, %s2571_s24 }
  0xf3   : > { %v3113_v53 = vpop.permute.xlu1 %409  ;;  %v3115_v29 = vpop.permute.xlu0 %407 }
  0xf5   : > { %653 = vrot.lane.b32.xlu1 %v3118_v21, %s2571_s24  ;;  %651 = vrot.lane.b32.xlu0 %v3121_v50, %s2571_s24 }
  0xf7   : > { %v3127_v25 = vpop.permute.xlu1 %413  ;;  %v3129_v18 = vpop.permute.xlu0 %411 }
  0xf9   : > { %657 = vrot.lane.b32.xlu1 %v3132_v51, %s2571_s24  ;;  %655 = vrot.lane.b32.xlu0 %v3135_v26, %s2571_s24 }
  0xfb   : > { %v3141_v19 = vpop.permute.xlu1 %417  ;;  %v3143_v31 = vpop.permute.xlu0 %415 }
  0xfd   : > { %731 = vrot.lane.b32.xlu1 %v2774_v2, %s2572_s10  ;;  %729 = vrot.lane.b32.xlu0 %v2767_v0, %s2572_s10  ;;  %v1483_v2 = vld [vmem:[#allocation5 + $0x10] sm:$0xff] }
  0xfe   : > { %v2268_v17 = vpack.c.bf16 %v1484_v49, %v1483_v2 }
  0xff   : > { %v3149_v60 = vpop.permute.xlu1 %421  ;;  %v3151_v16 = vpop.permute.xlu0 %419 }
 0x100   : > { %2269 = vmatprep.subr.bf16.mxu0 %v2268_v17  ;;  %2273 = vmatprep.subr.bf16.mxu1 %v2268_v17 }
 0x101   : > { %829 = vrot.lane.b32.xlu1 %v2898_v34, %s2573_s11  ;;  %827 = vrot.lane.b32.xlu0 %v2901_v35, %s2573_s11  ;;  %v1485_v34 = vld [vmem:[#allocation5 + $0x20] sm:$0xf] }
 0x102   : > { %2271 = vmatpush3.bf16.msra.mxu0 %v2268_v17  ;;  %2276 = vmatpush3.bf16.msra.mxu1 %v2268_v17 }
 0x103   : > { %v3157_v0 = vpop.permute.xlu1 %425  ;;  %v3159_v48 = vpop.permute.xlu0 %423  ;;  %2214 = vmatprep.subr.msk.mxu0 %vm1583_vm1, %v1485_v34  ;;  %2274 = vmatprep.subr.msk.mxu1 %vm1583_vm1, %v1485_v34 }
 0x105   : > { %927 = vrot.lane.b32.xlu1 %v3065_v59, %s2574_s7  ;;  %925 = vrot.lane.b32.xlu0 %v3068_v62, %s2574_s7 }
 0x106   : > { %2215 = vmatpush3.msk.msra.mxu0 %vm1583_vm1, %v1485_v34  ;;  %2277 = vmatpush3.msk.msra.mxu1 %vm1583_vm1, %v1485_v34 }
 0x107   : > { %v3165_v35 = vpop.permute.xlu1 %429  ;;  %v3167_v49 = vpop.permute.xlu0 %427 }
 0x109   : > { %733 = vrot.lane.b32.xlu1 %v2784_v5, %s2572_s10  ;;  %1023 = vrot.lane.b32.xlu0 %v2784_v5, %s2575_s8 }
 0x10b   : > { %v3173_v1 = vpop.permute.xlu1 %433  ;;  %v3175_v30 = vpop.permute.xlu0 %431 }
 0x10d   : > { %1121 = vrot.lane.b32.xlu1 %v2911_v37, %s2576_s18  ;;  %1025 = vrot.lane.b32.xlu0 %v2781_v4, %s2575_s8 }
 0x10f   : > { %v3181_v17 = vpop.permute.xlu1 %437  ;;  %v3183_v2 = vpop.permute.xlu0 %435 }
 0x111   : > { %831 = vrot.lane.b32.xlu1 %v2911_v37, %s2573_s11  ;;  %735 = vrot.lane.b32.xlu0 %v2781_v4, %s2572_s10 }
 0x113   : > { %v3189_v5 = vpop.permute.xlu1 %505  ;;  %v3191_v34 = vpop.permute.xlu0 %503 }
 0x115   : > { %833 = vrot.lane.b32.xlu1 %v2908_v36, %s2573_s11  ;;  %1123 = vrot.lane.b32.xlu0 %v2908_v36, %s2576_s18 }
 0x117   : > { %v3197_v59 = vpop.permute.xlu1 %509  ;;  %v3199_v62 = vpop.permute.xlu0 %507 }
 0x118   : > { %4243 = vst [vmem:[#allocation41_spill] sm:$0xff] %v3197_v59 }
 0x119   : > { %931 = vrot.lane.b32.xlu1 %v3042_v27, %s2574_s7  ;;  %929 = vrot.lane.b32.xlu0 %v3079_v24, %s2574_s7  ;;  %v1227_v24 = vsel %vm1217_vm0, %v3090_v57, %v3060_v33  ;;  %v1229_v33 = vsel %vm1217_vm0, %v3104_v52, %v3074_v63 }
 0x11b   : > { %v3205_v4 = vpop.permute.xlu1 %513  ;;  %v3207_v37 = vpop.permute.xlu0 %511 }
 0x11c   : > { %4244 = vst [vmem:[#allocation42_spill] sm:$0xff] %v3205_v4  ;;  %4245 = vst [vmem:[#allocation43_spill] sm:$0xff] %v3207_v37 }
 0x11d   : > { %737 = vrot.lane.b32.xlu1 %v2794_v7, %s2572_s10  ;;  %1027 = vrot.lane.b32.xlu0 %v2794_v7, %s2575_s8  ;;  %v1226_v7 = vsel %vm1217_vm0, %v3093_v54, %v3062_v58  ;;  %v1228_v58 = vsel %vm1217_vm0, %v3107_v20, %v3076_v22 }
 0x11f   : > { %v518_v36 = vpop.permute.xlu1 %517  ;;  %v3213_v59 = vpop.permute.xlu0 %515 }
 0x120   : > { %4246 = vst [vmem:[#allocation44_spill] sm:$0xff] %v3213_v59  ;;  %v3217_v27 = vsel %vm1250_vm2, %v3054_v32, %v518_v36 }
 0x121   : > { %1125 = vrot.lane.b32.xlu1 %v2921_v39, %s2576_s18  ;;  %1029 = vrot.lane.b32.xlu0 %v2791_v6, %s2575_s8 }
 0x123   : > { %v522_v4 = vpop.permute.xlu1 %521  ;;  %v520_v59 = vpop.permute.xlu0 %519 }
 0x124   : > { %v3230_v37 = vsel %vm1250_vm2, %v1227_v24, %v522_v4  ;;  %v3233_v32 = vsel %vm1250_vm2, %v1226_v7, %v520_v59 }
 0x125   : > { %835 = vrot.lane.b32.xlu1 %v2921_v39, %s2573_s11  ;;  %739 = vrot.lane.b32.xlu0 %v2791_v6, %s2572_s10  ;;  %v1231_v6 = vsel %vm1217_vm0, %v3118_v21, %v3085_v28  ;;  %v1230_v39 = vsel %vm1217_vm0, %v3121_v50, %v3087_v56  ;;  %v1232_v56 = vsel %vm1217_vm0, %v3135_v26, %v3101_v23 }
 0x127   : > { %v526_v36 = vpop.permute.xlu1 %525  ;;  %v524_v24 = vpop.permute.xlu0 %523 }
 0x128   : > { %v3246_v4 = vsel %vm1250_vm2, %v1229_v33, %v526_v36  ;;  %v3249_v59 = vsel %vm1250_vm2, %v1228_v58, %v524_v24  ;;  %v3278_v36 = vld [vmem:[%s2756_s9 + $0xc8] sm:$0xff]  ;;  %v3281_v24 = vld [vmem:[%s2756_s9 + $0xc0] sm:$0xff] }
 0x129   : > { %837 = vrot.lane.b32.xlu1 %v2918_v38, %s2573_s11  ;;  %1127 = vrot.lane.b32.xlu0 %v2918_v38, %s2576_s18  ;;  %v1233_v38 = vsel %vm1217_vm0, %v3132_v51, %v3099_v55  ;;  %v1235_v23 = vsel %vm1217_vm0, %v3278_v36, %v3113_v53  ;;  %v1234_v55 = vsel %vm1217_vm0, %v3281_v24, %v3115_v29 }
 0x12b   : > { %v530_v63 = vpop.permute.xlu1 %529  ;;  %v528_v22 = vpop.permute.xlu0 %527 }
 0x12c   : > { %v3262_v7 = vsel %vm1250_vm2, %v1231_v6, %v530_v63  ;;  %v3265_v33 = vsel %vm1250_vm2, %v1230_v39, %v528_v22  ;;  %v3300_v63 = vld [vmem:[%s2756_s9 + $0xe0] sm:$0xff]  ;;  %v3303_v22 = vld [vmem:[%s2756_s9 + $0xd8] sm:$0xff] }
 0x12d   : > { %935 = vrot.lane.b32.xlu1 %v3090_v57, %s2574_s7  ;;  %933 = vrot.lane.b32.xlu0 %v3093_v54, %s2574_s7  ;;  %v1237_v53 = vsel %vm1217_vm0, %v3300_v63, %v3127_v25  ;;  %v1236_v29 = vsel %vm1217_vm0, %v3303_v22, %v3129_v18 }
 0x12f   : > { %v534_v28 = vpop.permute.xlu1 %533  ;;  %v532_v58 = vpop.permute.xlu0 %531 }
 0x130   : > { %v3284_v57 = vsel %vm1250_vm2, %v1233_v38, %v534_v28  ;;  %v3287_v54 = vsel %vm1250_vm2, %v1232_v56, %v532_v58  ;;  %v3322_v58 = vld [vmem:[%s2756_s9 + $0xf8] sm:$0xff] }
 0x131   : > { %741 = vrot.lane.b32.xlu1 %v2804_v9, %s2572_s10  ;;  %1031 = vrot.lane.b32.xlu0 %v2804_v9, %s2575_s8  ;;  %v1239_v18 = vsel %vm1217_vm0, %v3322_v58, %v3141_v19 }
 0x133   : > { %v538_v6 = vpop.permute.xlu1 %537  ;;  %v536_v39 = vpop.permute.xlu0 %535 }
 0x134   : > { %v3306_v38 = vsel %vm1250_vm2, %v1235_v23, %v538_v6  ;;  %v3309_v9 = vsel %vm1250_vm2, %v1234_v55, %v536_v39  ;;  %v3325_v23 = vld [vmem:[%s2756_s9 + $0xf0] sm:$0xff] }
 0x135   : > { %1129 = vrot.lane.b32.xlu1 %v2931_v41, %s2576_s18  ;;  %1033 = vrot.lane.b32.xlu0 %v2801_v8, %s2575_s8  ;;  %v1238_v25 = vsel %vm1217_vm0, %v3325_v23, %v3143_v31 }
 0x137   : > { %v542_v56 = vpop.permute.xlu1 %541  ;;  %v540_v28 = vpop.permute.xlu0 %539 }
 0x138   : > { %v3328_v55 = vsel %vm1250_vm2, %v1237_v53, %v542_v56  ;;  %v3331_v6 = vsel %vm1250_vm2, %v1236_v29, %v540_v28  ;;  %v3344_v29 = vld [vmem:[%s2756_s9 + $0x110] sm:$0xff]  ;;  %v3347_v56 = vld [vmem:[%s2756_s9 + $0x108] sm:$0xff] }
 0x139   : > { %839 = vrot.lane.b32.xlu1 %v2931_v41, %s2573_s11  ;;  %743 = vrot.lane.b32.xlu0 %v2801_v8, %s2572_s10  ;;  %v1241_v19 = vsel %vm1217_vm0, %v3344_v29, %v3149_v60  ;;  %v1240_v31 = vsel %vm1217_vm0, %v3347_v56, %v3151_v16 }
 0x13b   : > { %v546_v39 = vpop.permute.xlu1 %545  ;;  %v544_v53 = vpop.permute.xlu0 %543 }
 0x13c   : > { %v3350_v41 = vsel %vm1250_vm2, %v1239_v18, %v546_v39  ;;  %v3353_v8 = vsel %vm1250_vm2, %v1238_v25, %v544_v53  ;;  %v3366_v25 = vld [vmem:[%s2756_s9 + $0x128] sm:$0xff]  ;;  %v3369_v39 = vld [vmem:[%s2756_s9 + $0x120] sm:$0xff] }
 0x13d   : > { %841 = vrot.lane.b32.xlu1 %v2928_v40, %s2573_s11  ;;  %1131 = vrot.lane.b32.xlu0 %v2928_v40, %s2576_s18  ;;  %v1243_v16 = vsel %vm1217_vm0, %v3366_v25, %v3157_v0  ;;  %v1242_v60 = vsel %vm1217_vm0, %v3369_v39, %v3159_v48 }
 0x13f   : > { %v550_v28 = vpop.permute.xlu1 %549  ;;  %v548_v18 = vpop.permute.xlu0 %547 }
 0x140   : > { %v3372_v53 = vsel %vm1250_vm2, %v1241_v19, %v550_v28  ;;  %v3375_v40 = vsel %vm1250_vm2, %v1240_v31, %v548_v18  ;;  %v3388_v31 = vld [vmem:[%s2756_s9 + $0x140] sm:$0xff]  ;;  %v3391_v18 = vld [vmem:[%s2756_s9 + $0x138] sm:$0xff] }
 0x141   : > { %4247 = vst [vmem:[#allocation45_spill] sm:$0xff] %v3372_v53  ;;  %4248 = vst [vmem:[#allocation46_spill] sm:$0xff] %v3375_v40  ;;  %939 = vrot.lane.b32.xlu1 %v3104_v52, %s2574_s7  ;;  %937 = vrot.lane.b32.xlu0 %v3107_v20, %s2574_s7  ;;  %v1245_v0 = vsel %vm1217_vm0, %v3388_v31, %v3165_v35  ;;  %v1244_v48 = vsel %vm1217_vm0, %v3391_v18, %v3167_v49 }
 0x143   : > { %v554_v19 = vpop.permute.xlu1 %553  ;;  %v552_v28 = vpop.permute.xlu0 %551 }
 0x144   : > { %v3394_v52 = vsel %vm1250_vm2, %v1243_v16, %v554_v19  ;;  %v3397_v20 = vsel %vm1250_vm2, %v1242_v60, %v552_v28  ;;  %v3410_v60 = vld [vmem:[%s2756_s9 + $0x158] sm:$0xff]  ;;  %v3413_v28 = vld [vmem:[%s2756_s9 + $0x150] sm:$0xff] }
 0x145   : > { %4249 = vst [vmem:[#allocation47_spill] sm:$0xff] %v3394_v52  ;;  %4250 = vst [vmem:[#allocation48_spill] sm:$0xff] %v3397_v20  ;;  %745 = vrot.lane.b32.xlu1 %v2814_v11, %s2572_s10  ;;  %1035 = vrot.lane.b32.xlu0 %v2814_v11, %s2575_s8  ;;  %v1247_v35 = vsel %vm1217_vm0, %v3410_v60, %v3173_v1  ;;  %v1246_v49 = vsel %vm1217_vm0, %v3413_v28, %v3175_v30 }
 0x147   : > { %v558_v16 = vpop.permute.xlu1 %557  ;;  %v556_v19 = vpop.permute.xlu0 %555 }
 0x148   : > { %v3416_v52 = vsel %vm1250_vm2, %v1245_v0, %v558_v16  ;;  %v3419_v11 = vsel %vm1250_vm2, %v1244_v48, %v556_v19  ;;  %v3432_v16 = vld [vmem:[%s2756_s9 + $0x170] sm:$0xff]  ;;  %v3435_v48 = vld [vmem:[%s2756_s9 + $0x168] sm:$0xff] }
 0x149   : > { %4251 = vst [vmem:[#allocation49_spill] sm:$0xff] %v3416_v52  ;;  %4252 = vst [vmem:[#allocation50_spill] sm:$0xff] %v3419_v11  ;;  %1133 = vrot.lane.b32.xlu1 %v2941_v43, %s2576_s18  ;;  %1037 = vrot.lane.b32.xlu0 %v2811_v10, %s2575_s8  ;;  %v1249_v1 = vsel %vm1217_vm0, %v3432_v16, %v3181_v17  ;;  %v1248_v30 = vsel %vm1217_vm0, %v3435_v48, %v3183_v2 }
 0x14b   : > { %v562_v20 = vpop.permute.xlu1 %561  ;;  %v560_v0 = vpop.permute.xlu0 %559 }
 0x14c   : > { %v3438_v19 = vsel %vm1250_vm2, %v1247_v35, %v562_v20  ;;  %v3441_v52 = vsel %vm1250_vm2, %v1246_v49, %v560_v0 }
 0x14d   : > { %4253 = vst [vmem:[#allocation51_spill] sm:$0xff] %v3438_v19  ;;  %4254 = vst [vmem:[#allocation52_spill] sm:$0xff] %v3441_v52  ;;  %843 = vrot.lane.b32.xlu1 %v2941_v43, %s2573_s11  ;;  %747 = vrot.lane.b32.xlu0 %v2811_v10, %s2572_s10 }
 0x14f   : > { %v566_v11 = vpop.permute.xlu1 %565  ;;  %v564_v20 = vpop.permute.xlu0 %563 }
 0x150   : > { %v3454_v35 = vsel %vm1250_vm2, %v1249_v1, %v566_v11  ;;  %v3457_v49 = vsel %vm1250_vm2, %v1248_v30, %v564_v20 }
 0x151   : > { %4255 = vst [vmem:[#allocation53_spill] sm:$0xff] %v3454_v35  ;;  %4256 = vst [vmem:[#allocation54_spill] sm:$0xff] %v3457_v49  ;;  %845 = vrot.lane.b32.xlu1 %v2938_v42, %s2573_s11  ;;  %1135 = vrot.lane.b32.xlu0 %v2938_v42, %s2576_s18  ;;  %v235_v35 = vld [vmem:[%s2756_s9] sm:$0xff] }
 0x153   : > { %v3463_v10 = vpop.permute.xlu1 %633  ;;  %v632_v43 = vpop.permute.xlu0 %631 }
 0x155   : > { %943 = vrot.lane.b32.xlu1 %v3118_v21, %s2574_s7  ;;  %941 = vrot.lane.b32.xlu0 %v3121_v50, %s2574_s7 }
 0x157   : > { %v3469_v17 = vpop.permute.xlu1 %637  ;;  %v3471_v2 = vpop.permute.xlu0 %635 }
 0x159   : > { %749 = vrot.lane.b32.xlu1 %v2824_v13, %s2572_s10  ;;  %1039 = vrot.lane.b32.xlu0 %v2824_v13, %s2575_s8 }
 0x15b   : > { %v3477_v42 = vpop.permute.xlu1 %641  ;;  %v3479_v11 = vpop.permute.xlu0 %639 }
 0x15d   : > { %1137 = vrot.lane.b32.xlu1 %v2951_v45, %s2576_s18  ;;  %1041 = vrot.lane.b32.xlu0 %v2821_v12, %s2575_s8 }
 0x15f   : > { %v3485_v21 = vpop.permute.xlu1 %645  ;;  %v3487_v50 = vpop.permute.xlu0 %643 }
 0x161   : > { %847 = vrot.lane.b32.xlu1 %v2951_v45, %s2573_s11  ;;  %751 = vrot.lane.b32.xlu0 %v2821_v12, %s2572_s10 }
 0x163   : > { %v3493_v13 = vpop.permute.xlu1 %649  ;;  %v3495_v0 = vpop.permute.xlu0 %647 }
 0x165   : > { %849 = vrot.lane.b32.xlu1 %v2948_v44, %s2573_s11  ;;  %1139 = vrot.lane.b32.xlu0 %v2948_v44, %s2576_s18 }
 0x167   : > { %v3501_v1 = vpop.permute.xlu1 %653  ;;  %v3503_v30 = vpop.permute.xlu0 %651 }
 0x169   : > { %947 = vrot.lane.b32.xlu1 %v3132_v51, %s2574_s7  ;;  %945 = vrot.lane.b32.xlu0 %v3135_v26, %s2574_s7 }
 0x16b   : > { %v3509_v12 = vpop.permute.xlu1 %657  ;;  %v3511_v45 = vpop.permute.xlu0 %655 }
 0x16d   : > { %753 = vrot.lane.b32.xlu1 %v2834_v15, %s2572_s10  ;;  %1043 = vrot.lane.b32.xlu0 %v2834_v15, %s2575_s8  ;;  %v1218_v15 = vsel %vm1217_vm0, %v235_v35, %v3021_v61 }
 0x16f   : > { %v732_v44 = vpop.permute.xlu1 %731  ;;  %v730_v20 = vpop.permute.xlu0 %729 }
 0x171   : > { %1141 = vrot.lane.b32.xlu1 %v2961_v47, %s2576_s18  ;;  %1045 = vrot.lane.b32.xlu0 %v2831_v14, %s2575_s8 }
 0x173   : > { %v830_v51 = vpop.permute.xlu1 %829  ;;  %v828_v26 = vpop.permute.xlu0 %827 }
 0x175   : > { %851 = vrot.lane.b32.xlu1 %v2961_v47, %s2573_s11  ;;  %755 = vrot.lane.b32.xlu0 %v2831_v14, %s2572_s10  ;;  %v1251_v47 = vsel %vm1250_vm2, %v1218_v15, %v3191_v34 }
 0x176   : > { %v1284_v14 = vsel %vm1283_vm3, %v1251_v47, %v632_v43 }
 0x177   : > { %v928_v49 = vpop.permute.xlu1 %927  ;;  %v926_v19 = vpop.permute.xlu0 %925  ;;  %v1317_v40 = vsel %vm1316_vm4, %v1284_v14, %v730_v20 }
 0x178   : > { %v1350_v61 = vsel %vm1349_vm5, %v1317_v40, %v828_v26  ;;  %v4257_v26 = vld [vmem:[#allocation15_spill] sm:$0xff] }
 0x179   : > { %853 = vrot.lane.b32.xlu1 %v2958_v46, %s2573_s11  ;;  %1143 = vrot.lane.b32.xlu0 %v2958_v46, %s2576_s18  ;;  %v236_v46 = vld [vmem:[%s2756_s9 + $0x8] sm:$0xff]  ;;  %v1383_v34 = vsel %vm1382_vm6, %v1350_v61, %v926_v19 }
 0x17a   : > { %v1219_v40 = vsel %vm1217_vm0, %v236_v46, %v3029_v3 }
 0x17b   : > { %v734_v52 = vpop.permute.xlu1 %733  ;;  %v1024_v53 = vpop.permute.xlu0 %1023 }
 0x17c   : > { %v1416_v35 = vsel %vm1415_vm7, %v1383_v34, %v1024_v53 }
 0x17d   : > { %659 = vrot.lane.b32.xlu1 %v3281_v24, %s2571_s24  ;;  %949 = vrot.lane.b32.xlu0 %v3281_v24, %s2574_s7  ;;  %v1252_v24 = vsel %vm1250_vm2, %v1219_v40, %v3189_v5 }
 0x17e   : > { %v1285_v53 = vsel %vm1283_vm3, %v1252_v24, %v3463_v10 }
 0x17f   : > { %v1122_v43 = vpop.permute.xlu1 %1121  ;;  %v1026_v15 = vpop.permute.xlu0 %1025  ;;  %v1318_v14 = vsel %vm1316_vm4, %v1285_v53, %v732_v44  ;;  %v4259_v44 = vld [vmem:[#allocation14_spill] sm:$0xff] }
 0x180   : > { %v1449_v20 = vsel %vm1448_vm8, %v1416_v35, %v1122_v43  ;;  %v1351_v3 = vsel %vm1349_vm5, %v1318_v14, %v830_v51  ;;  %v4258_v35 = vld [vmem:[#allocation22_spill] sm:$0xff] }
 0x181   : > { %1047 = vrot.lane.b32.xlu1 %v4257_v26, %s2575_s8  ;;  %951 = vrot.lane.b32.xlu0 %v3278_v36, %s2574_s7  ;;  %v1384_v61 = vsel %vm1382_vm6, %v1351_v3, %v928_v49  ;;  %v4262_v3 = vld [vmem:[#allocation21_spill] sm:$0xff] }
 0x182   : > { %2216 = vmatprep.mubr.msk.f32.mxu0 %vm1486_vm9, %v1449_v20  ;;  %v1417_v5 = vsel %vm1415_vm7, %v1384_v61, %v1026_v15  ;;  %v4260_v20 = vld [vmem:[#allocation31_spill] sm:$0xff] }
 0x183   : > { %v832_v19 = vpop.permute.xlu1 %831  ;;  %v736_v47 = vpop.permute.xlu0 %735 }
 0x185   : > { %757 = vrot.lane.b32.xlu1 %v4257_v26, %s2572_s10  ;;  %661 = vrot.lane.b32.xlu0 %v3278_v36, %s2571_s24  ;;  %v4261_v36 = vld [vmem:[#allocation36_spill] sm:$0xff] }
 0x186   : > { %v1220_v49 = vsel %vm1217_vm0, %v4261_v36, %v4260_v20 }
 0x187   : > { %v834_v46 = vpop.permute.xlu1 %833  ;;  %v1124_v34 = vpop.permute.xlu0 %1123  ;;  %v1253_v15 = vsel %vm1250_vm2, %v1220_v49, %v3199_v62 }
 0x188   : > { %v1450_v10 = vsel %vm1448_vm8, %v1417_v5, %v1124_v34  ;;  %v1286_v40 = vsel %vm1283_vm3, %v1253_v15, %v3471_v2 }
 0x189   : > { %1145 = vrot.lane.b32.xlu1 %v4258_v35, %s2576_s18  ;;  %1049 = vrot.lane.b32.xlu0 %v4259_v44, %s2575_s8  ;;  %v1319_v53 = vsel %vm1316_vm4, %v1286_v40, %v734_v52  ;;  %v4266_v40 = vld [vmem:[#allocation17_spill] sm:$0xff] }
 0x18a   : > { %2217 = vmatmul.mubr.msk.f32.vlgmr.msra.gmra.mrb[0].mxu0 %vm1486_vm9, %v1450_v10  ;;  %v1352_v14 = vsel %vm1349_vm5, %v1319_v53, %v832_v19  ;;  %v4263_v10 = vld [vmem:[#allocation32_spill] sm:$0xff]  ;;  %v4265_v19 = vld [vmem:[#allocation41_spill] sm:$0xff] }
 0x18b   : > { %v932_v51 = vpop.permute.xlu1 %931  ;;  %v930_v43 = vpop.permute.xlu0 %929 }
 0x18c   : > { %v1385_v61 = vsel %vm1382_vm6, %v1352_v14, %v930_v43 }
 0x18d   : > { %855 = vrot.lane.b32.xlu1 %v4258_v35, %s2573_s11  ;;  %759 = vrot.lane.b32.xlu0 %v4259_v44, %s2572_s10  ;;  %v4264_v35 = vld [vmem:[#allocation37_spill] sm:$0xff] }
 0x18e   : > { %v1221_v52 = vsel %vm1217_vm0, %v4264_v35, %v4263_v10 }
 0x18f   : > { %v738_v26 = vpop.permute.xlu1 %737  ;;  %v1028_v24 = vpop.permute.xlu0 %1027  ;;  %v1254_v44 = vsel %vm1250_vm2, %v1221_v52, %v4265_v19 }
 0x190   : > { %v1418_v5 = vsel %vm1415_vm7, %v1385_v61, %v1028_v24  ;;  %v1287_v43 = vsel %vm1283_vm3, %v1254_v44, %v3469_v17  ;;  %v4268_v61 = vld [vmem:[#allocation39_spill] sm:$0xff] }
 0x191   : > { %857 = vrot.lane.b32.xlu1 %v4262_v3, %s2573_s11  ;;  %1147 = vrot.lane.b32.xlu0 %v4262_v3, %s2576_s18  ;;  %v1320_v49 = vsel %vm1316_vm4, %v1287_v43, %v736_v47  ;;  %v4267_v3 = vld [vmem:[#allocation34_spill] sm:$0xff] }
 0x192   : > { %v1353_v15 = vsel %vm1349_vm5, %v1320_v49, %v834_v46 }
 0x193   : > { %v1126_v62 = vpop.permute.xlu1 %1125  ;;  %v1030_v34 = vpop.permute.xlu0 %1029 }
 0x194   : > { %v1451_v2 = vsel %vm1448_vm8, %v1418_v5, %v1126_v62  ;;  %v4269_v5 = vld [vmem:[#allocation24_spill] sm:$0xff] }
 0x195   : > { %663 = vrot.lane.b32.xlu1 %v3303_v22, %s2571_s24  ;;  %953 = vrot.lane.b32.xlu0 %v3303_v22, %s2574_s7  ;;  %v1386_v22 = vsel %vm1382_vm6, %v1353_v15, %v932_v51  ;;  %v1222_v51 = vsel %vm1217_vm0, %v4268_v61, %v4267_v3  ;;  %v4270_v62 = vld [vmem:[#allocation16_spill] sm:$0xff] }
 0x196   : > { %2219 = vmatprep.mubr.msk.f32.mxu0 %vm1486_vm9, %v1451_v2  ;;  %v1419_v24 = vsel %vm1415_vm7, %v1386_v22, %v1030_v34  ;;  %v4271_v34 = vld [vmem:[#allocation43_spill] sm:$0xff]  ;;  %v4273_v22 = vld [vmem:[#allocation38_spill] sm:$0xff] }
 0x197   : > { %v836_v20 = vpop.permute.xlu1 %835  ;;  %v740_v36 = vpop.permute.xlu0 %739  ;;  %v1255_v2 = vsel %vm1250_vm2, %v1222_v51, %v4271_v34 }
 0x199   : > { %1051 = vrot.lane.b32.xlu1 %v4266_v40, %s2575_s8  ;;  %955 = vrot.lane.b32.xlu0 %v3300_v63, %s2574_s7 }
 0x19b   : > { %v838_v53 = vpop.permute.xlu1 %837  ;;  %v1128_v14 = vpop.permute.xlu0 %1127 }
 0x19c   : > { %v1452_v17 = vsel %vm1448_vm8, %v1419_v24, %v1128_v14  ;;  %v4275_v24 = vld [vmem:[#allocation42_spill] sm:$0xff] }
 0x19d   : > { %761 = vrot.lane.b32.xlu1 %v4266_v40, %s2572_s10  ;;  %665 = vrot.lane.b32.xlu0 %v3300_v63, %s2571_s24  ;;  %v1288_v63 = vsel %vm1283_vm3, %v1255_v2, %v3479_v11  ;;  %v4272_v40 = vld [vmem:[#allocation33_spill] sm:$0xff] }
 0x19e   : > { %2220 = vmatmul.mubr.msk.f32.gmra.mrb[2].mxu0 %vm1486_vm9, %v1452_v17  ;;  %v1321_v52 = vsel %vm1316_vm4, %v1288_v63, %v738_v26  ;;  %v1223_v26 = vsel %vm1217_vm0, %v4273_v22, %v4272_v40  ;;  %v4276_v63 = vld [vmem:[#allocation19_spill] sm:$0xff]  ;;  %v4280_v40 = vld [vmem:[#allocation26_spill] sm:$0xff] }
 0x19f   : > { %v936_v47 = vpop.permute.xlu1 %935  ;;  %v934_v46 = vpop.permute.xlu0 %933  ;;  %v1354_v19 = vsel %vm1349_vm5, %v1321_v52, %v836_v20  ;;  %v4274_v20 = vld [vmem:[#allocation23_spill] sm:$0xff]  ;;  %v1256_v14 = vsel %vm1250_vm2, %v1223_v26, %v4275_v24  ;;  %v4279_v52 = vld [vmem:[#allocation44_spill] sm:$0xff]  ;;  %v4281_v22 = vld [vmem:[#allocation18_spill] sm:$0xff] }
 0x1a0   : > { %v1387_v44 = vsel %vm1382_vm6, %v1354_v19, %v934_v46  ;;  %v1289_v17 = vsel %vm1283_vm3, %v1256_v14, %v3477_v42 }
 0x1a1   : > { %1149 = vrot.lane.b32.xlu1 %v4269_v5, %s2576_s18  ;;  %1053 = vrot.lane.b32.xlu0 %v4270_v62, %s2575_s8  ;;  %v1322_v61 = vsel %vm1316_vm4, %v1289_v17, %v740_v36 }
 0x1a2   : > { %v1355_v51 = vsel %vm1349_vm5, %v1322_v61, %v838_v53 }
 0x1a3   : > { %v742_v10 = vpop.permute.xlu1 %741  ;;  %v1032_v35 = vpop.permute.xlu0 %1031 }
 0x1a4   : > { %v1420_v43 = vsel %vm1415_vm7, %v1387_v44, %v1032_v35  ;;  %v4277_v35 = vld [vmem:[#allocation35_spill] sm:$0xff] }
 0x1a5   : > { %859 = vrot.lane.b32.xlu1 %v4269_v5, %s2573_s11  ;;  %763 = vrot.lane.b32.xlu0 %v4270_v62, %s2572_s10  ;;  %v1388_v5 = vsel %vm1382_vm6, %v1355_v51, %v936_v47  ;;  %v4282_v51 = vld [vmem:[#allocation25_spill] sm:$0xff] }
 0x1a7   : > { %v1130_v49 = vpop.permute.xlu1 %1129  ;;  %v1034_v15 = vpop.permute.xlu0 %1033 }
 0x1a8   : > { %v1453_v11 = vsel %vm1448_vm8, %v1420_v43, %v1130_v49  ;;  %v1421_v62 = vsel %vm1415_vm7, %v1388_v5, %v1034_v15 }
 0x1a9   : > { %861 = vrot.lane.b32.xlu1 %v4274_v20, %s2573_s11  ;;  %1151 = vrot.lane.b32.xlu0 %v4274_v20, %s2576_s18 }
 0x1aa   : > { %2222 = vmatprep.mubr.msk.f32.mxu0 %vm1486_vm9, %v1453_v11 }
 0x1ab   : > { %v840_v46 = vpop.permute.xlu1 %839  ;;  %v744_v3 = vpop.permute.xlu0 %743 }
 0x1ad   : > { %667 = vrot.lane.b32.xlu1 %v3325_v23, %s2571_s24  ;;  %957 = vrot.lane.b32.xlu0 %v3325_v23, %s2574_s7  ;;  %v4278_v23 = vld [vmem:[#allocation40_spill] sm:$0xff] }
 0x1ae   : > { %v1224_v47 = vsel %vm1217_vm0, %v4278_v23, %v4277_v35  ;;  %v2370_v23 = vld [vmem:[%s2756_s9 + $0x109] sm:$0xff] }
 0x1af   : > { %v842_v34 = vpop.permute.xlu1 %841  ;;  %v1132_v2 = vpop.permute.xlu0 %1131  ;;  %v1257_v19 = vsel %vm1250_vm2, %v1224_v47, %v4279_v52 }
 0x1b0   : > { %v1454_v42 = vsel %vm1448_vm8, %v1421_v62, %v1132_v2  ;;  %v1290_v44 = vsel %vm1283_vm3, %v1257_v19, %v3487_v50 }
 0x1b1   : > { %1055 = vrot.lane.b32.xlu1 %v4276_v63, %s2575_s8  ;;  %959 = vrot.lane.b32.xlu0 %v3322_v58, %s2574_s7  ;;  %v1323_v15 = vsel %vm1316_vm4, %v1290_v44, %v742_v10  ;;  %v1291_v10 = vsel %vm1283_vm3, %v3217_v27, %v3485_v21 }
 0x1b2   : > { %2223 = vmatmul.mubr.msk.f32.gmra.mrb[4].mxu0 %vm1486_vm9, %v1454_v42  ;;  %v1356_v11 = vsel %vm1349_vm5, %v1323_v15, %v840_v46  ;;  %v1324_v46 = vsel %vm1316_vm4, %v1291_v10, %v744_v3  ;;  %v1294_v10 = vsel %vm1283_vm3, %v3249_v59, %v3503_v30  ;;  %v1295_v30 = vsel %vm1283_vm3, %v3246_v4, %v3501_v1 }
 0x1b3   : > { %v940_v36 = vpop.permute.xlu1 %939  ;;  %v938_v53 = vpop.permute.xlu0 %937  ;;  %v1357_v61 = vsel %vm1349_vm5, %v1324_v46, %v842_v34  ;;  %v4283_v34 = vld [vmem:[#allocation20_spill] sm:$0xff] }
 0x1b4   : > { %v1390_v5 = vsel %vm1382_vm6, %v1357_v61, %v940_v36 }
 0x1b5   : > { %765 = vrot.lane.b32.xlu1 %v4276_v63, %s2572_s10  ;;  %669 = vrot.lane.b32.xlu0 %v3322_v58, %s2571_s24  ;;  %v1389_v58 = vsel %vm1382_vm6, %v1356_v11, %v938_v53  ;;  %v1292_v63 = vsel %vm1283_vm3, %v3233_v32, %v3495_v0  ;;  %v4284_v0 = vld [vmem:[#allocation28_spill] sm:$0xff] }
 0x1b7   : > { %v746_v43 = vpop.permute.xlu1 %745  ;;  %v1036_v49 = vpop.permute.xlu0 %1035 }
 0x1b8   : > { %v1422_v26 = vsel %vm1415_vm7, %v1389_v58, %v1036_v49  ;;  %v1325_v35 = vsel %vm1316_vm4, %v1292_v63, %v746_v43  ;;  %v2371_v43 = vld [vmem:[%s2756_s9 + $0x111] sm:$0xff]  ;;  %v2373_v63 = vld [vmem:[%s2756_s9 + $0x129] sm:$0xff] }
 0x1b9   : > { %1153 = vrot.lane.b32.xlu1 %v4280_v40, %s2576_s18  ;;  %1057 = vrot.lane.b32.xlu0 %v4281_v22, %s2575_s8 }
 0x1bb   : > { %v1134_v20 = vpop.permute.xlu1 %1133  ;;  %v1038_v24 = vpop.permute.xlu0 %1037 }
 0x1bc   : > { %v1455_v50 = vsel %vm1448_vm8, %v1422_v26, %v1134_v20  ;;  %v1423_v62 = vsel %vm1415_vm7, %v1390_v5, %v1038_v24 }
 0x1bd   : > { %863 = vrot.lane.b32.xlu1 %v4280_v40, %s2573_s11  ;;  %767 = vrot.lane.b32.xlu0 %v4281_v22, %s2572_s10 }
 0x1be   : > { %2225 = vmatprep.mubr.msk.f32.mxu0 %vm1486_vm9, %v1455_v50 }
 0x1bf   : > { %v844_v14 = vpop.permute.xlu1 %843  ;;  %v748_v17 = vpop.permute.xlu0 %747 }
 0x1c1   : > { %865 = vrot.lane.b32.xlu1 %v4282_v51, %s2573_s11  ;;  %1155 = vrot.lane.b32.xlu0 %v4282_v51, %s2576_s18  ;;  %v2372_v51 = vld [vmem:[%s2756_s9 + $0x121] sm:$0xff] }
 0x1c3   : > { %v846_v2 = vpop.permute.xlu1 %845  ;;  %v1136_v42 = vpop.permute.xlu0 %1135 }
 0x1c4   : > { %v1456_v27 = vsel %vm1448_vm8, %v1423_v62, %v1136_v42 }
 0x1c5   : > { %671 = vrot.lane.b32.xlu1 %v3347_v56, %s2571_s24  ;;  %961 = vrot.lane.b32.xlu0 %v3347_v56, %s2574_s7  ;;  %v1358_v56 = vsel %vm1349_vm5, %v1325_v35, %v844_v14 }
 0x1c6   : > { %2226 = vmatmul.mubr.msk.f32.gmra.mrb[6].mxu0 %vm1486_vm9, %v1456_v27 }
 0x1c7   : > { %v944_v21 = vpop.permute.xlu1 %943  ;;  %v942_v3 = vpop.permute.xlu0 %941 }
 0x1c8   : > { %v1391_v47 = vsel %vm1382_vm6, %v1358_v56, %v942_v3 }
 0x1c9   : > { %1059 = vrot.lane.b32.xlu1 %v4283_v34, %s2575_s8  ;;  %963 = vrot.lane.b32.xlu0 %v3344_v29, %s2574_s7  ;;  %v4286_v34 = vld [vmem:[#allocation30_spill] sm:$0xff] }
 0x1cb   : > { %v750_v36 = vpop.permute.xlu1 %749  ;;  %v1040_v53 = vpop.permute.xlu0 %1039 }
 0x1cc   : > { %v1424_v52 = vsel %vm1415_vm7, %v1391_v47, %v1040_v53  ;;  %v1327_v46 = vsel %vm1316_vm4, %v1294_v10, %v750_v36  ;;  %v2374_v47 = vld [vmem:[%s2756_s9 + $0x12a] sm:$0xff] }
 0x1cd   : > { %769 = vrot.lane.b32.xlu1 %v2370_v23, %s2572_s10  ;;  %673 = vrot.lane.b32.xlu0 %v3344_v29, %s2571_s24  ;;  %v1293_v29 = vsel %vm1283_vm3, %v3230_v37, %v3493_v13  ;;  %v4285_v13 = vld [vmem:[#allocation27_spill] sm:$0xff]  ;;  %v4287_v23 = vld [vmem:[#allocation29_spill] sm:$0xff] }
 0x1ce   : > { %v1326_v11 = vsel %vm1316_vm4, %v1293_v29, %v748_v17 }
 0x1cf   : > { %v1138_v19 = vpop.permute.xlu1 %1137  ;;  %v1042_v44 = vpop.permute.xlu0 %1041  ;;  %v1359_v40 = vsel %vm1349_vm5, %v1326_v11, %v846_v2 }
 0x1d0   : > { %v1457_v32 = vsel %vm1448_vm8, %v1424_v52, %v1138_v19  ;;  %v1392_v22 = vsel %vm1382_vm6, %v1359_v40, %v944_v21  ;;  %v1297_v40 = vsel %vm1283_vm3, %v3262_v7, %v3509_v12 }
 0x1d1   : > { %1157 = vrot.lane.b32.xlu1 %v4284_v0, %s2576_s18  ;;  %1061 = vrot.lane.b32.xlu0 %v2371_v43, %s2575_s8  ;;  %v1425_v58 = vsel %vm1415_vm7, %v1392_v22, %v1042_v44  ;;  %v1296_v44 = vsel %vm1283_vm3, %v3265_v33, %v3511_v45 }
 0x1d2   : > { %2228 = vmatprep.mubr.msk.f32.mxu0 %vm1486_vm9, %v1457_v32 }
 0x1d3   : > { %v848_v49 = vpop.permute.xlu1 %847  ;;  %v752_v15 = vpop.permute.xlu0 %751 }
 0x1d4   : > { %v1360_v61 = vsel %vm1349_vm5, %v1327_v46, %v848_v49  ;;  %v1328_v21 = vsel %vm1316_vm4, %v1295_v30, %v752_v15  ;;  %v2375_v49 = vld [vmem:[%s2756_s9 + $0x139] sm:$0xff] }
 0x1d5   : > { %867 = vrot.lane.b32.xlu1 %v4284_v0, %s2573_s11  ;;  %771 = vrot.lane.b32.xlu0 %v2371_v43, %s2572_s10 }
 0x1d7   : > { %v850_v26 = vpop.permute.xlu1 %849  ;;  %v1140_v20 = vpop.permute.xlu0 %1139 }
 0x1d8   : > { %v1458_v37 = vsel %vm1448_vm8, %v1425_v58, %v1140_v20  ;;  %v1361_v3 = vsel %vm1349_vm5, %v1328_v21, %v850_v26 }
 0x1d9   : > { %869 = vrot.lane.b32.xlu1 %v4285_v13, %s2573_s11  ;;  %1159 = vrot.lane.b32.xlu0 %v4285_v13, %s2576_s18  ;;  %v2377_v13 = vld [vmem:[%s2756_s9 + $0x141] sm:$0xff] }
 0x1da   : > { %2229 = vmatmul.mubr.msk.f32.gmra.mrb[8].mxu0 %vm1486_vm9, %v1458_v37  ;;  %v2376_v37 = vld [vmem:[%s2756_s9 + $0x13a] sm:$0xff] }
 0x1db   : > { %v948_v24 = vpop.permute.xlu1 %947  ;;  %v946_v50 = vpop.permute.xlu0 %945 }
 0x1dc   : > { %v1393_v5 = vsel %vm1382_vm6, %v1360_v61, %v946_v50 }
 0x1dd   : > { %675 = vrot.lane.b32.xlu1 %v3369_v39, %s2571_s24  ;;  %965 = vrot.lane.b32.xlu0 %v3369_v39, %s2574_s7 }
 0x1df   : > { %v754_v14 = vpop.permute.xlu1 %753  ;;  %v1044_v17 = vpop.permute.xlu0 %1043 }
 0x1e0   : > { %v1426_v39 = vsel %vm1415_vm7, %v1393_v5, %v1044_v17  ;;  %v1329_v43 = vsel %vm1316_vm4, %v1296_v44, %v754_v14  ;;  %v2378_v17 = vld [vmem:[%s2756_s9 + $0x142] sm:$0xff] }
 0x1e1   : > { %1063 = vrot.lane.b32.xlu1 %v2372_v51, %s2575_s8  ;;  %967 = vrot.lane.b32.xlu0 %v3366_v25, %s2574_s7 }
 0x1e3   : > { %v1142_v62 = vpop.permute.xlu1 %1141  ;;  %v1046_v2 = vpop.permute.xlu0 %1045 }
 0x1e4   : > { %v1459_v59 = vsel %vm1448_vm8, %v1426_v39, %v1142_v62 }
 0x1e5   : > { %773 = vrot.lane.b32.xlu1 %v2372_v51, %s2572_s10  ;;  %677 = vrot.lane.b32.xlu0 %v3366_v25, %s2571_s24  ;;  %v1394_v25 = vsel %vm1382_vm6, %v1361_v3, %v948_v24 }
 0x1e6   : > { %2231 = vmatprep.mubr.msk.f32.mxu0 %vm1486_vm9, %v1459_v59  ;;  %v1427_v36 = vsel %vm1415_vm7, %v1394_v25, %v1046_v2  ;;  %v2379_v59 = vld [vmem:[%s2756_s9 + $0x151] sm:$0xff] }
 0x1e7   : > { %v852_v42 = vpop.permute.xlu1 %851  ;;  %v756_v27 = vpop.permute.xlu0 %755 }
 0x1e8   : > { %v1362_v29 = vsel %vm1349_vm5, %v1329_v43, %v852_v42  ;;  %v1330_v26 = vsel %vm1316_vm4, %v1297_v40, %v756_v27 }
 0x1e9   : > { %1161 = vrot.lane.b32.xlu1 %v4286_v34, %s2576_s18  ;;  %1065 = vrot.lane.b32.xlu0 %v2373_v63, %s2575_s8 }
 0x1eb   : > { %v854_v53 = vpop.permute.xlu1 %853  ;;  %v1144_v35 = vpop.permute.xlu0 %1143 }
 0x1ec   : > { %v1460_v4 = vsel %vm1448_vm8, %v1427_v36, %v1144_v35  ;;  %v1363_v20 = vsel %vm1349_vm5, %v1330_v26, %v854_v53  ;;  %v2380_v36 = vld [vmem:[%s2756_s9 + $0x152] sm:$0xff]  ;;  %v2384_v26 = vld [vmem:[%s2756_s9 + $0x16a] sm:$0xff] }
 0x1ed   : > { %871 = vrot.lane.b32.xlu1 %v4286_v34, %s2573_s11  ;;  %775 = vrot.lane.b32.xlu0 %v2373_v63, %s2572_s10  ;;  %v2381_v53 = vld [vmem:[%s2756_s9 + $0x159] sm:$0xff] }
 0x1ee   : > { %2232 = vmatmul.mubr.msk.f32.gmra.mrb[10].mxu0 %vm1486_vm9, %v1460_v4 }
 0x1ef   : > { %v660_v1 = vpop.permute.xlu1 %659  ;;  %v950_v56 = vpop.permute.xlu0 %949 }
 0x1f0   : > { %v1298_v51 = vsel %vm1283_vm3, %v3287_v54, %v660_v1 }
 0x1f1   : > { %873 = vrot.lane.b32.xlu1 %v4287_v23, %s2573_s11  ;;  %1163 = vrot.lane.b32.xlu0 %v2374_v47, %s2576_s18  ;;  %v2382_v47 = vld [vmem:[%s2756_s9 + $0x15a] sm:$0xff] }
 0x1f3   : > { %v1048_v52 = vpop.permute.xlu1 %1047  ;;  %v952_v19 = vpop.permute.xlu0 %951 }
 0x1f5   : > { %679 = vrot.lane.b32.xlu1 %v3391_v18, %s2571_s24  ;;  %969 = vrot.lane.b32.xlu0 %v3391_v18, %s2574_s7  ;;  %v1395_v18 = vsel %vm1382_vm6, %v1362_v29, %v950_v56 }
 0x1f6   : > { %v1428_v15 = vsel %vm1415_vm7, %v1395_v18, %v1048_v52 }
 0x1f7   : > { %v758_v32 = vpop.permute.xlu1 %757  ;;  %v662_v0 = vpop.permute.xlu0 %661 }
 0x1f8   : > { %v1331_v62 = vsel %vm1316_vm4, %v1298_v51, %v758_v32  ;;  %v1299_v21 = vsel %vm1283_vm3, %v3284_v57, %v662_v0 }
 0x1f9   : > { %1067 = vrot.lane.b32.xlu1 %v2375_v49, %s2575_s8  ;;  %971 = vrot.lane.b32.xlu0 %v3388_v31, %s2574_s7 }
 0x1fb   : > { %v1146_v11 = vpop.permute.xlu1 %1145  ;;  %v1050_v33 = vpop.permute.xlu0 %1049 }
 0x1fc   : > { %v1461_v45 = vsel %vm1448_vm8, %v1428_v15, %v1146_v11 }
 0x1fd   : > { %777 = vrot.lane.b32.xlu1 %v2375_v49, %s2572_s10  ;;  %681 = vrot.lane.b32.xlu0 %v3388_v31, %s2571_s24  ;;  %v1396_v31 = vsel %vm1382_vm6, %v1363_v20, %v952_v19  ;;  %v2383_v49 = vld [vmem:[%s2756_s9 + $0x169] sm:$0xff]  ;;  %v2385_v20 = vld [vmem:[%s2756_s9 + $0x171] sm:$0xff] }
 0x1fe   : > { %2234 = vmatprep.mubr.msk.f32.mxu0 %vm1486_vm9, %v1461_v45  ;;  %v1429_v24 = vsel %vm1415_vm7, %v1396_v31, %v1050_v33 }
 0x1ff   : > { %v856_v22 = vpop.permute.xlu1 %855  ;;  %v760_v58 = vpop.permute.xlu0 %759 }
 0x200   : > { %v1364_v2 = vsel %vm1349_vm5, %v1331_v62, %v856_v22  ;;  %v1332_v63 = vsel %vm1316_vm4, %v1299_v21, %v760_v58 }
 0x201   : > { %1165 = vrot.lane.b32.xlu1 %v2376_v37, %s2576_s18  ;;  %1069 = vrot.lane.b32.xlu0 %v2377_v13, %s2575_s8 }
 0x203   : > { %v858_v50 = vpop.permute.xlu1 %857  ;;  %v1148_v10 = vpop.permute.xlu0 %1147 }
 0x204   : > { %v1462_v7 = vsel %vm1448_vm8, %v1429_v24, %v1148_v10  ;;  %v1365_v25 = vsel %vm1349_vm5, %v1332_v63, %v858_v50  ;;  %v2386_v10 = vld [vmem:[%s2756_s9 + $0x172] sm:$0xff] }
 0x205   : > { %875 = vrot.lane.b32.xlu1 %v2376_v37, %s2573_s11  ;;  %779 = vrot.lane.b32.xlu0 %v2377_v13, %s2572_s10 }
 0x206   : > { %2235 = vmatmul.mubr.msk.f32.gmra.mrb[12].mxu0 %vm1486_vm9, %v1462_v7  ;;  %v267_v7 = vld [vmem:[%s2756_s9 + $0x180] sm:$0xff] }
 0x207   : > { %v664_v12 = vpop.permute.xlu1 %663  ;;  %v954_v14 = vpop.permute.xlu0 %953 }
 0x208   : > { %v1397_v30 = vsel %vm1382_vm6, %v1364_v2, %v954_v14  ;;  %v1300_v44 = vsel %vm1283_vm3, %v3309_v9, %v664_v12 }
 0x209   : > { %877 = vrot.lane.b32.xlu1 %v2378_v17, %s2573_s11  ;;  %1167 = vrot.lane.b32.xlu0 %v2378_v17, %s2576_s18  ;;  %v303_v17 = vld [vmem:[%s2756_s9 + $0x181] sm:$0xff] }
 0x20b   : > { %v1052_v46 = vpop.permute.xlu1 %1051  ;;  %v956_v61 = vpop.permute.xlu0 %955 }
 0x20d   : > { %683 = vrot.lane.b32.xlu1 %v3413_v28, %s2571_s24  ;;  %973 = vrot.lane.b32.xlu0 %v3413_v28, %s2574_s7  ;;  %v1430_v28 = vsel %vm1415_vm7, %v1397_v30, %v1052_v46  ;;  %v268_v46 = vld [vmem:[%s2756_s9 + $0x188] sm:$0xff] }
 0x20f   : > { %v762_v5 = vpop.permute.xlu1 %761  ;;  %v666_v39 = vpop.permute.xlu0 %665 }
 0x210   : > { %v1333_v43 = vsel %vm1316_vm4, %v1300_v44, %v762_v5  ;;  %v1301_v33 = vsel %vm1283_vm3, %v3306_v38, %v666_v39 }
 0x211   : > { %1071 = vrot.lane.b32.xlu1 %v2379_v59, %s2575_s8  ;;  %975 = vrot.lane.b32.xlu0 %v3410_v60, %s2574_s7 }
 0x213   : > { %v1150_v42 = vpop.permute.xlu1 %1149  ;;  %v1054_v54 = vpop.permute.xlu0 %1053 }
 0x214   : > { %v1463_v27 = vsel %vm1448_vm8, %v1430_v28, %v1150_v42  ;;  %v339_v42 = vld [vmem:[%s2756_s9 + $0x182] sm:$0xff] }
 0x215   : > { %781 = vrot.lane.b32.xlu1 %v2379_v59, %s2572_s10  ;;  %685 = vrot.lane.b32.xlu0 %v3410_v60, %s2571_s24  ;;  %v1398_v60 = vsel %vm1382_vm6, %v1365_v25, %v956_v61 }
 0x216   : > { %2237 = vmatprep.mubr.msk.f32.mxu0 %vm1486_vm9, %v1463_v27  ;;  %v1431_v35 = vsel %vm1415_vm7, %v1398_v60, %v1054_v54  ;;  %v304_v54 = vld [vmem:[%s2756_s9 + $0x189] sm:$0xff] }
 0x217   : > { %v860_v3 = vpop.permute.xlu1 %859  ;;  %v764_v34 = vpop.permute.xlu0 %763 }
 0x218   : > { %v1366_v29 = vsel %vm1349_vm5, %v1333_v43, %v860_v3  ;;  %v1334_v22 = vsel %vm1316_vm4, %v1301_v33, %v764_v34 }
 0x219   : > { %1169 = vrot.lane.b32.xlu1 %v2380_v36, %s2576_s18  ;;  %1073 = vrot.lane.b32.xlu0 %v2381_v53, %s2575_s8 }
 0x21b   : > { %v862_v4 = vpop.permute.xlu1 %861  ;;  %v1152_v1 = vpop.permute.xlu0 %1151 }
 0x21c   : > { %v1464_v57 = vsel %vm1448_vm8, %v1431_v35, %v1152_v1  ;;  %v1367_v58 = vsel %vm1349_vm5, %v1334_v22, %v862_v4  ;;  %v340_v35 = vld [vmem:[%s2756_s9 + $0x18a] sm:$0xff] }
 0x21d   : > { %879 = vrot.lane.b32.xlu1 %v2380_v36, %s2573_s11  ;;  %783 = vrot.lane.b32.xlu0 %v2381_v53, %s2572_s10 }
 0x21e   : > { %2238 = vmatmul.mubr.msk.f32.gmra.mrb[14].mxu0 %vm1486_vm9, %v1464_v57  ;;  %v270_v57 = vld [vmem:[%s2756_s9 + $0x1a0] sm:$0xff] }
 0x21f   : > { %v668_v56 = vpop.permute.xlu1 %667  ;;  %v958_v23 = vpop.permute.xlu0 %957 }
 0x220   : > { %v1399_v18 = vsel %vm1382_vm6, %v1366_v29, %v958_v23  ;;  %v1302_v61 = vsel %vm1283_vm3, %v3331_v6, %v668_v56  ;;  %v269_v56 = vld [vmem:[%s2756_s9 + $0x198] sm:$0xff] }
 0x221   : > { %881 = vrot.lane.b32.xlu1 %v2382_v47, %s2573_s11  ;;  %1171 = vrot.lane.b32.xlu0 %v2382_v47, %s2576_s18 }
 0x223   : > { %v1056_v52 = vpop.permute.xlu1 %1055  ;;  %v960_v19 = vpop.permute.xlu0 %959 }
 0x225   : > { %687 = vrot.lane.b32.xlu1 %v3435_v48, %s2571_s24  ;;  %977 = vrot.lane.b32.xlu0 %v3435_v48, %s2574_s7  ;;  %v1432_v48 = vsel %vm1415_vm7, %v1399_v18, %v1056_v52  ;;  %v306_v52 = vld [vmem:[%s2756_s9 + $0x1a1] sm:$0xff] }
 0x226   : > { %v342_v18 = vld [vmem:[%s2756_s9 + $0x1a2] sm:$0xff] }
 0x227   : > { %v766_v32 = vpop.permute.xlu1 %765  ;;  %v670_v0 = vpop.permute.xlu0 %669 }
 0x228   : > { %v1335_v39 = vsel %vm1316_vm4, %v1302_v61, %v766_v32  ;;  %v1303_v27 = vsel %vm1283_vm3, %v3328_v55, %v670_v0 }
 0x229   : > { %1075 = vrot.lane.b32.xlu1 %v2383_v49, %s2575_s8  ;;  %979 = vrot.lane.b32.xlu0 %v3432_v16, %s2574_s7 }
 0x22b   : > { %v1154_v15 = vpop.permute.xlu1 %1153  ;;  %v1058_v9 = vpop.permute.xlu0 %1057 }
 0x22c   : > { %v1465_v11 = vsel %vm1448_vm8, %v1432_v48, %v1154_v15  ;;  %v341_v48 = vld [vmem:[%s2756_s9 + $0x19a] sm:$0xff] }
 0x22d   : > { %785 = vrot.lane.b32.xlu1 %v2383_v49, %s2572_s10  ;;  %689 = vrot.lane.b32.xlu0 %v3432_v16, %s2571_s24  ;;  %v1400_v16 = vsel %vm1382_vm6, %v1367_v58, %v960_v19  ;;  %v305_v19 = vld [vmem:[%s2756_s9 + $0x199] sm:$0xff]  ;;  %s1954_s9 = scalar_lea.sflag [#allocation4], %s2752_s25 }
 0x22e   : > { %2240 = vmatprep.mubr.msk.f32.mxu1 %vm1486_vm9, %v1465_v11  ;;  %v1433_v37 = vsel %vm1415_vm7, %v1400_v16, %v1058_v9 }
 0x22f   : > { %v864_v45 = vpop.permute.xlu1 %863  ;;  %v768_v40 = vpop.permute.xlu0 %767 }
 0x230   : > { %v1368_v62 = vsel %vm1349_vm5, %v1335_v39, %v864_v45  ;;  %v1336_v34 = vsel %vm1316_vm4, %v1303_v27, %v768_v40 }
 0x231   : > { %1173 = vrot.lane.b32.xlu1 %v2384_v26, %s2576_s18  ;;  %1077 = vrot.lane.b32.xlu0 %v2385_v20, %s2575_s8 }
 0x233   : > { %v866_v13 = vpop.permute.xlu1 %865  ;;  %v1156_v38 = vpop.permute.xlu0 %1155 }
 0x234   : > { %v1466_v31 = vsel %vm1448_vm8, %v1433_v37, %v1156_v38  ;;  %v1369_v63 = vsel %vm1349_vm5, %v1336_v34, %v866_v13 }
 0x235   : > { %883 = vrot.lane.b32.xlu1 %v2384_v26, %s2573_s11  ;;  %787 = vrot.lane.b32.xlu0 %v2385_v20, %s2572_s10 }
 0x236   : > { %2241 = vmatmul.mubr.msk.f32.vlgmr.msra.gmra.mrb[0].mxu1 %vm1486_vm9, %v1466_v31 }
 0x237   : > { %v672_v24 = vpop.permute.xlu1 %671  ;;  %v962_v50 = vpop.permute.xlu0 %961 }
 0x238   : > { %v1401_v2 = vsel %vm1382_vm6, %v1368_v62, %v962_v50  ;;  %v1304_v44 = vsel %vm1283_vm3, %v3353_v8, %v672_v24 }
 0x239   : > { %885 = vrot.lane.b32.xlu1 %v2386_v10, %s2573_s11  ;;  %1175 = vrot.lane.b32.xlu0 %v2386_v10, %s2576_s18 }
 0x23b   : > { %v1060_v12 = vpop.permute.xlu1 %1059  ;;  %v964_v14 = vpop.permute.xlu0 %963 }
 0x23c   : > { %v1434_v59 = vsel %vm1415_vm7, %v1401_v2, %v1060_v12  ;;  %v1402_v25 = vsel %vm1382_vm6, %v1369_v63, %v964_v14 }
 0x23d   : > { %691 = vrot.lane.b32.xlu1 %v267_v7, %s2571_s24  ;;  %981 = vrot.lane.b32.xlu0 %v267_v7, %s2574_s7 }
 0x23f   : > { %v770_v51 = vpop.permute.xlu1 %769  ;;  %v3898_v5 = vpop.permute.xlu0 %673 }
 0x240   : > { %v1337_v43 = vsel %vm1316_vm4, %v1304_v44, %v770_v51  ;;  %v1305_v22 = vsel %vm1283_vm3, %v3350_v41, %v3898_v5 }
 0x241   : > { %1079 = vrot.lane.b32.xlu1 %v303_v17, %s2575_s8  ;;  %983 = vrot.lane.b32.xlu0 %v268_v46, %s2574_s7 }
 0x243   : > { %v1158_v30 = vpop.permute.xlu1 %1157  ;;  %v1062_v28 = vpop.permute.xlu0 %1061 }
 0x244   : > { %v1467_v6 = vsel %vm1448_vm8, %v1434_v59, %v1158_v30  ;;  %v1435_v36 = vsel %vm1415_vm7, %v1402_v25, %v1062_v28  ;;  %v4289_v25 = vld [vmem:[#allocation45_spill] sm:$0xff] }
 0x245   : > { %789 = vrot.lane.b32.xlu1 %v303_v17, %s2572_s10  ;;  %693 = vrot.lane.b32.xlu0 %v268_v46, %s2571_s24  ;;  %v4288_v46 = vld [vmem:[#allocation46_spill] sm:$0xff]  ;;  %s2577_s24 = smov [#allocation7]  }
 0x246   : > { %2243 = vmatprep.mubr.msk.f32.mxu1 %vm1486_vm9, %v1467_v6 }
 0x247   : > { %v868_v21 = vpop.permute.xlu1 %867  ;;  %v772_v3 = vpop.permute.xlu0 %771 }
 0x248   : > { %v1370_v29 = vsel %vm1349_vm5, %v1337_v43, %v868_v21  ;;  %v1338_v37 = vsel %vm1316_vm4, %v1305_v22, %v772_v3 }
 0x249   : > { %1177 = vrot.lane.b32.xlu1 %v339_v42, %s2576_s18  ;;  %1081 = vrot.lane.b32.xlu0 %v304_v54, %s2575_s8 }
 0x24b   : > { %v870_v53 = vpop.permute.xlu1 %869  ;;  %v1160_v60 = vpop.permute.xlu0 %1159 }
 0x24c   : > { %v1468_v55 = vsel %vm1448_vm8, %v1435_v36, %v1160_v60  ;;  %v1371_v13 = vsel %vm1349_vm5, %v1338_v37, %v870_v53 }
 0x24d   : > { %887 = vrot.lane.b32.xlu1 %v339_v42, %s2573_s11  ;;  %791 = vrot.lane.b32.xlu0 %v304_v54, %s2572_s10  ;;  %s2449_s10 = sshll.u32 %s2577_s24, 4  ;;  %s2450_s10 = int_to_ptr.vmem [resolvable:$false] %s2449_s10 }
 0x24e   : > { %2244 = vmatmul.mubr.msk.f32.gmra.mrb[2].mxu1 %vm1486_vm9, %v1468_v55  ;;  %p2452_p12 = scmp.lt.s32.totalorder %s4076_s27, %s2450_s10 }
 0x24f   : > { %v676_v4 = vpop.permute.xlu1 %675  ;;  %v966_v1 = vpop.permute.xlu0 %965 }
 0x250   : > { %v1403_v49 = vsel %vm1382_vm6, %v1370_v29, %v966_v1  ;;  %v1306_v61 = vsel %vm1283_vm3, %v4288_v46, %v676_v4  ;;  %v4290_v29 = vld [vmem:[#allocation48_spill] sm:$0xff] }
 0x251   : > { %889 = vrot.lane.b32.xlu1 %v340_v35, %s2573_s11  ;;  %1179 = vrot.lane.b32.xlu0 %v340_v35, %s2576_s18  ;;  %s2451_s11 = scalar_lea.vmem %s2450_s10, 8192 }
 0x252   : > { %p2453_p13 = scmp.lt.s32.totalorder %s2451_s11, %s2445_s22 }
 0x253   : > { %v1064_v23 = vpop.permute.xlu1 %1063  ;;  %v968_v47 = vpop.permute.xlu0 %967 }
 0x254   : > { %v1436_v15 = vsel %vm1415_vm7, %v1403_v49, %v1064_v23  ;;  %v1404_v31 = vsel %vm1382_vm6, %v1371_v13, %v968_v47  ;;  %v4291_v13 = vld [vmem:[#allocation47_spill] sm:$0xff]  ;;  %p2454_p0 = por %p2453_p13, %p2452_p12 }
 0x255   : > { %987 = vrot.lane.b32.xlu1 %v270_v57, %s2574_s7  ;;  %985 = vrot.lane.b32.xlu0 %v269_v56, %s2574_s7 }
 0x256   : > { %p2455_p5 = pnand %p2454_p0, %p2448_p8 }
 0x257   : > { %v774_v32 = vpop.permute.xlu1 %773  ;;  %v678_v0 = vpop.permute.xlu0 %677 }
 0x258   : > { %v1339_v39 = vsel %vm1316_vm4, %v1306_v61, %v774_v32  ;;  %v1307_v36 = vsel %vm1283_vm3, %v4289_v25, %v678_v0 }
 0x259   : > { %1085 = vrot.lane.b32.xlu1 %v306_v52, %s2575_s8  ;;  %1083 = vrot.lane.b32.xlu0 %v305_v19, %s2575_s8 }
 0x25b   : > { %v1162_v9 = vpop.permute.xlu1 %1161  ;;  %v1066_v11 = vpop.permute.xlu0 %1065 }
 0x25c   : > { %v1469_v8 = vsel %vm1448_vm8, %v1436_v15, %v1162_v9  ;;  %v1437_v24 = vsel %vm1415_vm7, %v1404_v31, %v1066_v11 }
 0x25d   : > { %v2218_v33 = vpop.f32.mrb[0].mxu0  ;;  %1183 = vrot.lane.b32.xlu1 %v342_v18, %s2576_s18  ;;  %1181 = vrot.lane.b32.xlu0 %v341_v48, %s2576_s18 }
 0x25e   : > { %1813 = vst [vmem:[%s3947_s30 + $0x8] sm:$0xff] %v2218_v33  ;;  %v1882_v45 = vmul.f32 %v2218_v33, %v2218_v33  ;;  %v1653_v40 = vpop.f32.mrb[1].mxu0  ;;  %2246 = vmatprep.mubr.msk.f32.mxu1 %vm1486_vm9, %v1469_v8 }
 0x25f   : > { %1812 = vst [vmem:[%s3947_s30] sm:$0xff] %v1653_v40  ;;  %v1844_v58 = vadd.f32 %v2218_v33, %v1653_v40  ;;  %v1881_v26 = vmul.f32 %v1653_v40, %v1653_v40  ;;  %v872_v20 = vpop.permute.xlu1 %871  ;;  %v776_v16 = vpop.permute.xlu0 %775 }
 0x260   : > { %v1372_v62 = vsel %vm1349_vm5, %v1339_v39, %v872_v20  ;;  %v1340_v35 = vsel %vm1316_vm4, %v1307_v36, %v776_v16 }
 0x261   : > { %v1913_v38 = vadd.f32 %v1882_v45, %v1881_v26 }
 0x263   : > { %v874_v50 = vpop.permute.xlu1 %873  ;;  %v1164_v10 = vpop.permute.xlu0 %1163 }
 0x264   : > { %v1470_v7 = vsel %vm1448_vm8, %v1437_v24, %v1164_v10  ;;  %v1373_v4 = vsel %vm1349_vm5, %v1340_v35, %v874_v50  ;;  %v4293_v35 = vld [vmem:[#allocation49_spill] sm:$0xff] }
 0x265   : > { %2247 = vmatmul.mubr.msk.f32.gmra.mrb[4].mxu1 %vm1486_vm9, %v1470_v7 }
 0x267   : > { %v680_v41 = vpop.permute.xlu1 %679  ;;  %v970_v12 = vpop.permute.xlu0 %969 }
 0x268   : > { %v1405_v59 = vsel %vm1382_vm6, %v1372_v62, %v970_v12  ;;  %v1308_v49 = vsel %vm1283_vm3, %v4290_v29, %v680_v41 }
 0x26b   : > { %v1068_v14 = vpop.permute.xlu1 %1067  ;;  %v972_v17 = vpop.permute.xlu0 %971 }
 0x26c   : > { %v1438_v28 = vsel %vm1415_vm7, %v1405_v59, %v1068_v14  ;;  %v1406_v1 = vsel %vm1382_vm6, %v1373_v4, %v972_v17 }
 0x26f   : > { %v778_v51 = vpop.permute.xlu1 %777  ;;  %v682_v5 = vpop.permute.xlu0 %681 }
 0x270   : > { %v1341_v11 = vsel %vm1316_vm4, %v1308_v49, %v778_v51 }
 0x271   : > { %v2221_v2 = vpop.f32.mrb[2].mxu0 }
 0x272   : > { %1815 = vst [vmem:[%s3947_s30 + $0x18] sm:$0xff] %v2221_v2  ;;  %v1663_v30 = vpop.f32.mrb[3].mxu0  ;;  %v1884_v3 = vmul.f32 %v2221_v2, %v2221_v2 }
 0x273   : > { %1814 = vst [vmem:[%s3947_s30 + $0x10] sm:$0xff] %v1663_v30  ;;  %v1845_v6 = vadd.f32 %v1844_v58, %v1663_v30  ;;  %v1883_v42 = vmul.f32 %v1663_v30, %v1663_v30  ;;  %v1166_v54 = vpop.permute.xlu1 %1165  ;;  %v1070_v27 = vpop.permute.xlu0 %1069 }
 0x274   : > { %v1471_v21 = vsel %vm1448_vm8, %v1438_v28, %v1166_v54  ;;  %v1439_v57 = vsel %vm1415_vm7, %v1406_v1, %v1070_v27 }
 0x275   : > { %v1914_v34 = vadd.f32 %v1913_v38, %v1883_v42  ;;  %2249 = vmatprep.mubr.msk.f32.mxu1 %vm1486_vm9, %v1471_v21  ;;  %v1846_v63 = vadd.f32 %v2221_v2, %v1845_v6  ;;  %v1309_v38 = vsel %vm1283_vm3, %v4291_v13, %v682_v5  ;;  %v4292_v42 = vld [vmem:[#allocation50_spill] sm:$0xff] }
 0x277   : > { %v876_v53 = vpop.permute.xlu1 %875  ;;  %v780_v60 = vpop.permute.xlu0 %779  ;;  %v1915_v55 = vadd.f32 %v1914_v34, %v1884_v3 }
 0x278   : > { %v1374_v8 = vsel %vm1349_vm5, %v1341_v11, %v876_v53  ;;  %v1342_v50 = vsel %vm1316_vm4, %v1309_v38, %v780_v60 }
 0x27b   : > { %v878_v56 = vpop.permute.xlu1 %877  ;;  %v1168_v23 = vpop.permute.xlu0 %1167 }
 0x27c   : > { %v1472_v47 = vsel %vm1448_vm8, %v1439_v57, %v1168_v23  ;;  %v1375_v10 = vsel %vm1349_vm5, %v1342_v50, %v878_v56  ;;  %v4295_v50 = vld [vmem:[#allocation51_spill] sm:$0xff] }
 0x27d   : > { %2250 = vmatmul.mubr.msk.f32.gmra.mrb[6].mxu1 %vm1486_vm9, %v1472_v47 }
 0x27f   : > { %v684_v52 = vpop.permute.xlu1 %683  ;;  %v974_v19 = vpop.permute.xlu0 %973 }
 0x280   : > { %v1407_v22 = vsel %vm1382_vm6, %v1374_v8, %v974_v19  ;;  %v1310_v54 = vsel %vm1283_vm3, %v4292_v42, %v684_v52 }
 0x283   : > { %v1072_v44 = vpop.permute.xlu1 %1071  ;;  %v976_v32 = vpop.permute.xlu0 %975 }
 0x284   : > { %v1440_v58 = vsel %vm1415_vm7, %v1407_v22, %v1072_v44  ;;  %v1408_v7 = vsel %vm1382_vm6, %v1375_v10, %v976_v32 }
 0x285   : > { %v2224_v0 = vpop.f32.mrb[4].mxu0 }
 0x286   : > { %1817 = vst [vmem:[%s3947_s30 + $0x28] sm:$0xff] %v2224_v0  ;;  %v1673_v43 = vpop.f32.mrb[5].mxu0  ;;  %v1886_v33 = vmul.f32 %v2224_v0, %v2224_v0 }
 0x287   : > { %1816 = vst [vmem:[%s3947_s30 + $0x20] sm:$0xff] %v1673_v43  ;;  %v1847_v18 = vadd.f32 %v1846_v63, %v1673_v43  ;;  %v1885_v48 = vmul.f32 %v1673_v43, %v1673_v43  ;;  %v782_v15 = vpop.permute.xlu1 %781  ;;  %v686_v9 = vpop.permute.xlu0 %685 }
 0x288   : > { %v1343_v34 = vsel %vm1316_vm4, %v1310_v54, %v782_v15  ;;  %v1311_v4 = vsel %vm1283_vm3, %v4293_v35, %v686_v9 }
 0x289   : > { %v1916_v45 = vadd.f32 %v1915_v55, %v1885_v48  ;;  %v1848_v40 = vadd.f32 %v2224_v0, %v1847_v18 }
 0x28b   : > { %v1170_v26 = vpop.permute.xlu1 %1169  ;;  %v1074_v20 = vpop.permute.xlu0 %1073  ;;  %v1917_v16 = vadd.f32 %v1916_v45, %v1886_v33 }
 0x28c   : > { %v1473_v37 = vsel %vm1448_vm8, %v1440_v58, %v1170_v26  ;;  %v1441_v41 = vsel %vm1415_vm7, %v1408_v7, %v1074_v20 }
 0x28d   : > { %2252 = vmatprep.mubr.msk.f32.mxu1 %vm1486_vm9, %v1473_v37 }
 0x28f   : > { %v880_v31 = vpop.permute.xlu1 %879  ;;  %v784_v24 = vpop.permute.xlu0 %783 }
 0x290   : > { %v1376_v63 = vsel %vm1349_vm5, %v1343_v34, %v880_v31  ;;  %v1344_v56 = vsel %vm1316_vm4, %v1311_v4, %v784_v24  ;;  %v4297_v34 = vld [vmem:[#allocation53_spill] sm:$0xff] }
 0x293   : > { %v882_v12 = vpop.permute.xlu1 %881  ;;  %v1172_v14 = vpop.permute.xlu0 %1171 }
 0x294   : > { %v1474_v17 = vsel %vm1448_vm8, %v1441_v41, %v1172_v14  ;;  %v1377_v23 = vsel %vm1349_vm5, %v1344_v56, %v882_v12 }
 0x295   : > { %2253 = vmatmul.mubr.msk.f32.gmra.mrb[8].mxu1 %vm1486_vm9, %v1474_v17 }
 0x297   : > { %v688_v46 = vpop.permute.xlu1 %687  ;;  %v978_v61 = vpop.permute.xlu0 %977 }
 0x298   : > { %v1409_v25 = vsel %vm1382_vm6, %v1376_v63, %v978_v61 }
 0x299   : > { %v2227_v51 = vpop.f32.mrb[6].mxu0 }
 0x29a   : > { %1819 = vst [vmem:[%s3947_s30 + $0x38] sm:$0xff] %v2227_v51  ;;  %v1683_v5 = vpop.f32.mrb[7].mxu0  ;;  %v1888_v30 = vmul.f32 %v2227_v51, %v2227_v51 }
 0x29b   : > { %1818 = vst [vmem:[%s3947_s30 + $0x30] sm:$0xff] %v1683_v5  ;;  %v1849_v39 = vadd.f32 %v1848_v40, %v1683_v5  ;;  %v1887_v62 = vmul.f32 %v1683_v5, %v1683_v5  ;;  %v1076_v2 = vpop.permute.xlu1 %1075  ;;  %v980_v59 = vpop.permute.xlu0 %979  ;;  %v4294_v40 = vld [vmem:[#allocation52_spill] sm:$0xff] }
 0x29c   : > { %v1442_v36 = vsel %vm1415_vm7, %v1409_v25, %v1076_v2  ;;  %v1410_v47 = vsel %vm1382_vm6, %v1377_v23, %v980_v59  ;;  %v1312_v22 = vsel %vm1283_vm3, %v4294_v40, %v688_v46 }
 0x29d   : > { %v1918_v28 = vadd.f32 %v1917_v16, %v1887_v62  ;;  %v1850_v6 = vadd.f32 %v2227_v51, %v1849_v39 }
 0x29f   : > { %v786_v27 = vpop.permute.xlu1 %785  ;;  %v690_v21 = vpop.permute.xlu0 %689  ;;  %v1919_v3 = vadd.f32 %v1918_v28, %v1888_v30 }
 0x2a0   : > { %v1345_v20 = vsel %vm1316_vm4, %v1312_v22, %v786_v27  ;;  %v1313_v10 = vsel %vm1283_vm3, %v4295_v50, %v690_v21  ;;  %v4296_v21 = vld [vmem:[#allocation54_spill] sm:$0xff] }
 0x2a3   : > { %v1174_v53 = vpop.permute.xlu1 %1173  ;;  %v1078_v60 = vpop.permute.xlu0 %1077 }
 0x2a4   : > { %v1475_v55 = vsel %vm1448_vm8, %v1442_v36, %v1174_v53  ;;  %v1443_v52 = vsel %vm1415_vm7, %v1410_v47, %v1078_v60 }
 0x2a5   : > { %2255 = vmatprep.mubr.msk.f32.mxu1 %vm1486_vm9, %v1475_v55 }
 0x2a7   : > { %v884_v1 = vpop.permute.xlu1 %883  ;;  %v788_v57 = vpop.permute.xlu0 %787 }
 0x2a8   : > { %v1378_v16 = vsel %vm1349_vm5, %v1345_v20, %v884_v1  ;;  %v1346_v12 = vsel %vm1316_vm4, %v1313_v10, %v788_v57 }
 0x2ab   : > { %v886_v19 = vpop.permute.xlu1 %885  ;;  %v1176_v44 = vpop.permute.xlu0 %1175 }
 0x2ac   : > { %v1476_v32 = vsel %vm1448_vm8, %v1443_v52, %v1176_v44  ;;  %v1379_v14 = vsel %vm1349_vm5, %v1346_v12, %v886_v19 }
 0x2ad   : > { %v2230_v0 = vpop.f32.mrb[8].mxu0  ;;  %2256 = vmatmul.mubr.msk.f32.gmra.mrb[10].mxu1 %vm1486_vm9, %v1476_v32 }
 0x2ae   : > { %1821 = vst [vmem:[%s3947_s30 + $0x48] sm:$0xff] %v2230_v0  ;;  %v1693_v43 = vpop.f32.mrb[9].mxu0  ;;  %v1890_v15 = vmul.f32 %v2230_v0, %v2230_v0 }
 0x2af   : > { %1820 = vst [vmem:[%s3947_s30 + $0x40] sm:$0xff] %v1693_v43  ;;  %v1851_v29 = vadd.f32 %v1850_v6, %v1693_v43  ;;  %v1889_v49 = vmul.f32 %v1693_v43, %v1693_v43  ;;  %v692_v18 = vpop.permute.xlu1 %691  ;;  %v982_v48 = vpop.permute.xlu0 %981 }
 0x2b0   : > { %v1411_v37 = vsel %vm1382_vm6, %v1378_v16, %v982_v48 }
 0x2b1   : > { %v1920_v9 = vadd.f32 %v1919_v3, %v1889_v49  ;;  %v1852_v11 = vadd.f32 %v2230_v0, %v1851_v29  ;;  %v1314_v3 = vsel %vm1283_vm3, %v4296_v21, %v692_v18 }
 0x2b3   : > { %v1080_v8 = vpop.permute.xlu1 %1079  ;;  %v984_v33 = vpop.permute.xlu0 %983  ;;  %v1921_v45 = vadd.f32 %v1920_v9, %v1890_v15 }
 0x2b4   : > { %v1444_v13 = vsel %vm1415_vm7, %v1411_v37, %v1080_v8  ;;  %v1412_v46 = vsel %vm1382_vm6, %v1379_v14, %v984_v33 }
 0x2b7   : > { %v790_v58 = vpop.permute.xlu1 %789  ;;  %v694_v26 = vpop.permute.xlu0 %693 }
 0x2b8   : > { %v1315_v63 = vsel %vm1283_vm3, %v4297_v34, %v694_v26  ;;  %v1347_v53 = vsel %vm1316_vm4, %v1314_v3, %v790_v58 }
 0x2bb   : > { %v1178_v38 = vpop.permute.xlu1 %1177  ;;  %v1082_v31 = vpop.permute.xlu0 %1081 }
 0x2bc   : > { %v1477_v24 = vsel %vm1448_vm8, %v1444_v13, %v1178_v38  ;;  %v1445_v51 = vsel %vm1415_vm7, %v1412_v46, %v1082_v31 }
 0x2bd   : > { %2258 = vmatprep.mubr.msk.f32.mxu1 %vm1486_vm9, %v1477_v24 }
 0x2bf   : > { %v888_v7 = vpop.permute.xlu1 %887  ;;  %v792_v41 = vpop.permute.xlu0 %791 }
 0x2c0   : > { %v1348_v60 = vsel %vm1316_vm4, %v1315_v63, %v792_v41  ;;  %v1380_v55 = vsel %vm1349_vm5, %v1347_v53, %v888_v7 }
 0x2c1   : > { %v2233_v17 = vpop.f32.mrb[10].mxu0 }
 0x2c2   : > { %1823 = vst [vmem:[%s3947_s30 + $0x58] sm:$0xff] %v2233_v17  ;;  %v1703_v61 = vpop.f32.mrb[11].mxu0  ;;  %v1892_v30 = vmul.f32 %v2233_v17, %v2233_v17 }
 0x2c3   : > { %1822 = vst [vmem:[%s3947_s30 + $0x50] sm:$0xff] %v1703_v61  ;;  %v1853_v5 = vadd.f32 %v1852_v11, %v1703_v61  ;;  %v1891_v39 = vmul.f32 %v1703_v61, %v1703_v61  ;;  %v890_v62 = vpop.permute.xlu1 %889  ;;  %v1180_v2 = vpop.permute.xlu0 %1179 }
 0x2c4   : > { %v1478_v59 = vsel %vm1448_vm8, %v1445_v51, %v1180_v2  ;;  %v1381_v35 = vsel %vm1349_vm5, %v1348_v60, %v890_v62 }
 0x2c5   : > { %v1922_v28 = vadd.f32 %v1921_v45, %v1891_v39  ;;  %2259 = vmatmul.mubr.msk.f32.gmra.mrb[12].mxu1 %vm1486_vm9, %v1478_v59  ;;  %v1854_v6 = vadd.f32 %v2233_v17, %v1853_v5 }
 0x2c7   : > { %v988_v42 = vpop.permute.xlu1 %987  ;;  %v986_v54 = vpop.permute.xlu0 %985  ;;  %v1923_v27 = vadd.f32 %v1922_v28, %v1892_v30 }
 0x2c8   : > { %v1414_v4 = vsel %vm1382_vm6, %v1381_v35, %v988_v42  ;;  %v1413_v1 = vsel %vm1382_vm6, %v1380_v55, %v986_v54 }
 0x2cb   : > { %v1086_v25 = vpop.permute.xlu1 %1085  ;;  %v1084_v36 = vpop.permute.xlu0 %1083 }
 0x2cc   : > { %v1447_v57 = vsel %vm1415_vm7, %v1414_v4, %v1086_v25  ;;  %v1446_v56 = vsel %vm1415_vm7, %v1413_v1, %v1084_v36 }
 0x2cf   : > { %v1184_v23 = vpop.permute.xlu1 %1183  ;;  %v1182_v47 = vpop.permute.xlu0 %1181 }
 0x2d0   : > { %v1480_v52 = vsel %vm1448_vm8, %v1447_v57, %v1184_v23  ;;  %v1479_v19 = vsel %vm1448_vm8, %v1446_v56, %v1182_v47 }
 0x2d1   : > { %2261 = vmatprep.mubr.msk.f32.mxu1 %vm1486_vm9, %v1479_v19 }
 0x2d2   : > { %2262 = vmatmul.mubr.msk.f32.gmra.mrb[14].mxu1 %vm1486_vm9, %v1480_v52 }
 0x2d9   : > { %v2236_v44 = vpop.f32.mrb[12].mxu0 }
 0x2da   : > { %1825 = vst [vmem:[%s3947_s30 + $0x68] sm:$0xff] %v2236_v44  ;;  %v1713_v32 = vpop.f32.mrb[13].mxu0  ;;  %v1894_v29 = vmul.f32 %v2236_v44, %v2236_v44 }
 0x2db   : > { %1824 = vst [vmem:[%s3947_s30 + $0x60] sm:$0xff] %v1713_v32  ;;  %v1855_v0 = vadd.f32 %v1854_v6, %v1713_v32  ;;  %v1893_v43 = vmul.f32 %v1713_v32, %v1713_v32 }
 0x2dd   : > { %v1924_v49 = vadd.f32 %v1923_v27, %v1893_v43  ;;  %v1856_v18 = vadd.f32 %v2236_v44, %v1855_v0 }
 0x2df   : > { %v1925_v48 = vadd.f32 %v1924_v49, %v1894_v29 }
 0x2f1   : > { %v2239_v15 = vpop.f32.mrb[14].mxu0 }
 0x2f2   : > { %1827 = vst [vmem:[%s3947_s30 + $0x78] sm:$0xff] %v2239_v15  ;;  %v1723_v9 = vpop.f32.mrb[15].mxu0  ;;  %v1896_v33 = vmul.f32 %v2239_v15, %v2239_v15 }
 0x2f3   : > { %1826 = vst [vmem:[%s3947_s30 + $0x70] sm:$0xff] %v1723_v9  ;;  %v1857_v11 = vadd.f32 %v1856_v18, %v1723_v9  ;;  %v1895_v8 = vmul.f32 %v1723_v9, %v1723_v9 }
 0x2f5   : > { %v1858_v45 = vadd.f32 %v2239_v15, %v1857_v11  ;;  %v1926_v40 = vadd.f32 %v1925_v48, %v1895_v8 }
 0x2f7   : > { %v1927_v22 = vadd.f32 %v1926_v40, %v1896_v33 }
 0x309   : > { %v2242_v58 = vpop.f32.mrb[0].mxu1 }
 0x30a   : > { %1829 = vst [vmem:[%s3947_s30 + $0x88] sm:$0xff] %v2242_v58  ;;  %v1733_v26 = vpop.f32.mrb[1].mxu1  ;;  %v1898_v37 = vmul.f32 %v2242_v58, %v2242_v58 }
 0x30b   : > { %1828 = vst [vmem:[%s3947_s30 + $0x80] sm:$0xff] %v1733_v26  ;;  %v1859_v20 = vadd.f32 %v1858_v45, %v1733_v26  ;;  %v1897_v16 = vmul.f32 %v1733_v26, %v1733_v26 }
 0x30d   : > { %v1928_v13 = vadd.f32 %v1927_v22, %v1897_v16  ;;  %v1860_v38 = vadd.f32 %v2242_v58, %v1859_v20 }
 0x30f   : > { %v1929_v31 = vadd.f32 %v1928_v13, %v1898_v37 }
 0x321   : > { %v2245_v24 = vpop.f32.mrb[2].mxu1 }
 0x322   : > { %1831 = vst [vmem:[%s3947_s30 + $0x98] sm:$0xff] %v2245_v24  ;;  %v1743_v50 = vpop.f32.mrb[3].mxu1  ;;  %v1900_v41 = vmul.f32 %v2245_v24, %v2245_v24 }
 0x323   : > { %1830 = vst [vmem:[%s3947_s30 + $0x90] sm:$0xff] %v1743_v50  ;;  %v1861_v10 = vadd.f32 %v1860_v38, %v1743_v50  ;;  %v1899_v7 = vmul.f32 %v1743_v50, %v1743_v50 }
 0x325   : > { %v1930_v12 = vadd.f32 %v1929_v31, %v1899_v7  ;;  %v1862_v14 = vadd.f32 %v2245_v24, %v1861_v10 }
 0x327   : > { %v1931_v17 = vadd.f32 %v1930_v12, %v1900_v41 }
 0x338   : > { %v2248_v46 = vpop.f32.mrb[4].mxu1 }
 0x339   : > { %1833 = vst [vmem:[%s3947_s30 + $0xa8] sm:$0xff] %v2248_v46  ;;  %v1753_v61 = vpop.f32.mrb[5].mxu1  ;;  %v1902_v39 = vmul.f32 %v2248_v46, %v2248_v46 }
 0x33a   : > { %1832 = vst [vmem:[%s3947_s30 + $0xa0] sm:$0xff] %v1753_v61  ;;  %v1863_v51 = vadd.f32 %v1862_v14, %v1753_v61  ;;  %v1901_v5 = vmul.f32 %v1753_v61, %v1753_v61 }
 0x33c   : > { %v1932_v62 = vadd.f32 %v1931_v17, %v1901_v5  ;;  %v1864_v2 = vadd.f32 %v2248_v46, %v1863_v51 }
 0x33e   : > { %v1933_v59 = vadd.f32 %v1932_v62, %v1902_v39 }
 0x350   : > { %v2251_v30 = vpop.f32.mrb[6].mxu1 }
 0x351   : > { %1835 = vst [vmem:[%s3947_s30 + $0xb8] sm:$0xff] %v2251_v30  ;;  %v1763_v28 = vpop.f32.mrb[7].mxu1  ;;  %v1904_v54 = vmul.f32 %v2251_v30, %v2251_v30 }
 0x352   : > { %1834 = vst [vmem:[%s3947_s30 + $0xb0] sm:$0xff] %v1763_v28  ;;  %v1865_v6 = vadd.f32 %v1864_v2, %v1763_v28  ;;  %v1903_v42 = vmul.f32 %v1763_v28, %v1763_v28 }
 0x354   : > { %v1934_v27 = vadd.f32 %v1933_v59, %v1903_v42  ;;  %v1866_v21 = vadd.f32 %v2251_v30, %v1865_v6 }
 0x356   : > { %v1935_v3 = vadd.f32 %v1934_v27, %v1904_v54 }
 0x368   : > { %v2254_v34 = vpop.f32.mrb[8].mxu1 }
 0x369   : > { %1837 = vst [vmem:[%s3947_s30 + $0xc8] sm:$0xff] %v2254_v34  ;;  %v1773_v63 = vpop.f32.mrb[9].mxu1  ;;  %v1906_v53 = vmul.f32 %v2254_v34, %v2254_v34 }
 0x36a   : > { %1836 = vst [vmem:[%s3947_s30 + $0xc0] sm:$0xff] %v1773_v63  ;;  %v1867_v25 = vadd.f32 %v1866_v21, %v1773_v63  ;;  %v1905_v36 = vmul.f32 %v1773_v63, %v1773_v63 }
 0x36c   : > { %v1936_v60 = vadd.f32 %v1935_v3, %v1905_v36  ;;  %v1868_v55 = vadd.f32 %v2254_v34, %v1867_v25 }
 0x36e   : > { %v1937_v35 = vadd.f32 %v1936_v60, %v1906_v53 }
 0x380   : > { %v2257_v4 = vpop.f32.mrb[10].mxu1 }
 0x381   : > { %1839 = vst [vmem:[%s3947_s30 + $0xd8] sm:$0xff] %v2257_v4  ;;  %v1783_v1 = vpop.f32.mrb[11].mxu1  ;;  %v1908_v23 = vmul.f32 %v2257_v4, %v2257_v4 }
 0x382   : > { %1838 = vst [vmem:[%s3947_s30 + $0xd0] sm:$0xff] %v1783_v1  ;;  %v1869_v57 = vadd.f32 %v1868_v55, %v1783_v1  ;;  %v1907_v56 = vmul.f32 %v1783_v1, %v1783_v1 }
 0x384   : > { %v1938_v47 = vadd.f32 %v1937_v35, %v1907_v56  ;;  %v1870_v52 = vadd.f32 %v2257_v4, %v1869_v57 }
 0x386   : > { %v1939_v19 = vadd.f32 %v1938_v47, %v1908_v23 }
 0x398   : > { %v2260_v44 = vpop.f32.mrb[12].mxu1 }
 0x399   : > { %1841 = vst [vmem:[%s3947_s30 + $0xe8] sm:$0xff] %v2260_v44  ;;  %v1793_v32 = vpop.f32.mrb[13].mxu1  ;;  %v1910_v29 = vmul.f32 %v2260_v44, %v2260_v44 }
 0x39a   : > { %1840 = vst [vmem:[%s3947_s30 + $0xe0] sm:$0xff] %v1793_v32  ;;  %v1871_v0 = vadd.f32 %v1870_v52, %v1793_v32  ;;  %v1909_v43 = vmul.f32 %v1793_v32, %v1793_v32 }
 0x39c   : > { %v1940_v49 = vadd.f32 %v1939_v19, %v1909_v43  ;;  %v1872_v18 = vadd.f32 %v2260_v44, %v1871_v0 }
 0x39e   : > { %v1941_v48 = vadd.f32 %v1940_v49, %v1910_v29 }
 0x3a5   : > { %v2263_v15 = vpop.f32.mrb[14].mxu1 }
 0x3a6   : > { %1843 = vst [vmem:[%s3947_s30 + $0xf8] sm:$0xff] %v2263_v15  ;;  %v1803_v9 = vpop.f32.mrb[15].mxu1 }
 0x3a7   : > { %1842 = vst [vmem:[%s3947_s30 + $0xf0] sm:$0xff] %v1803_v9  ;;  %v1873_v11 = vadd.f32 %v1872_v18, %v1803_v9  ;;  %v1911_v8 = vmul.f32 %v1803_v9, %v1803_v9 }
 0x3a8   : > { %2458 = shalt.err (!%p2455_p5)
}
 0x3a9   : > { %s2459_s7 = scalar_lea.hbm %s4074_s6, 4096  ;;  %s2463_s19 = scalar_lea.hbm %s4161_s2, 8192 }
 0x3aa   : > { %p2460_p9 = scmp.ne.s32.totalorder %s4074_s6, %s2459_s7  ;;  %p2464_p3 = scmp.lt.u32.totalorder %s4074_s6, %s4161_s2 }
 0x3ab   : > { %p2465_p7 = scmp.lt.u32.totalorder %s2463_s19, %s2459_s7  ;;  %p2467_p4 = scmp.lt.u32.totalorder %s2459_s7, %s4074_s6 }
 0x3ac   : > { %p2461_p1 = pnand %p2460_p9, %p2695_p10 }
 0x3ad   : > { %p2466_p11 = por %p2465_p7, %p2464_p3 }
 0x3ae   : > { %p2462_p2 = pneg %p2461_p1 }
 0x3af   : > { %p2468_p6 = por %p2467_p4, %p2466_p11 }
 0x3b1   : > { %p2469_p8 = pnand %p2468_p6, %p2462_p2 }
 0x3b3   : > { %2472 = shalt.err (!%p2469_p8)
}
 0x3b4   : > { %s2578_s4 = smov 128   ;;  %v1912_v33 = vmul.f32 %v2263_v15, %v2263_v15  ;;  %v1874_v45 = vadd.f32 %v2263_v15, %v1873_v11  ;;  %v1942_v40 = vadd.f32 %v1941_v48, %v1911_v8  ;;  %s2127_s26 = sshll.u32 %s2752_s25, 1  ;;  %vm1950_vm10 = vcmask 1040384  }
 0x3b5   : > { %2287 = dma.vmem_to_hbm [thread:$0]  (%p2695_p10), %s4076_s27, 4096, %s4074_s6, %s1954_s9, %s2578_s4, %s2578_s4, %s2570_s20  }
 0x3b6   : > { %v1875_v22 = vrot.slane %v1874_v45, 4  ;;  %v1943_v58 = vadd.f32 %v1942_v40, %v1912_v33  ;;  %s2165_s22 = sshll.u32 %s2555_s15, 5  ;;  %s230_s20 = scalar_lea.vmem [#allocation8], %s2127_s26 }
 0x3b7   : > { %s1992_s27 = sshll.u32 %s230_s20, 4  ;;  %s4110_s24 = scalar_lea.hbm %s4162_s3, %s2165_s22  ;;  %s4112_s27 = int_to_ptr.vmem [resolvable:$true] %s1992_s27 }
 0x3b8   : > { %v1876_v26 = vadd.f32 %v1875_v22, %v1874_v45  ;;  %v1944_v20 = vrot.slane %v1943_v58, 4  ;;  %s1959_s10 = scalar_lea.sflag [#allocation9], %s2752_s25  ;;  %s2473_s11 = scalar_lea.vmem %s4112_s27, 32 }
 0x3b9   : > { %p2474_p12 = scmp.ne.s32.totalorder %s4112_s27, %s2473_s11  ;;  %s2579_s15 = smov [#allocation8]  }
 0x3ba   : > { %v1877_v16 = vrot.slane %v1876_v26, 2  ;;  %v1945_v37 = vadd.f32 %v1944_v20, %v1943_v58  ;;  %s2477_s7 = sshll.u32 %s2579_s15, 4  ;;  %s2478_s7 = int_to_ptr.vmem [resolvable:$false] %s2477_s7 }
 0x3bb   : > { %p2475_p13 = pnand %p2474_p12, %p2695_p10  ;;  %s2479_s8 = scalar_lea.vmem %s2478_s7, 64 }
 0x3bc   : > { %v1878_v13 = vadd.f32 %v1877_v16, %v1876_v26  ;;  %v1946_v38 = vrot.slane %v1945_v37, 2  ;;  %p2480_p5 = scmp.lt.s32.totalorder %s4112_s27, %s2478_s7  ;;  %p2481_p9 = scmp.lt.s32.totalorder %s2479_s8, %s2473_s11 }
 0x3bd   : > { %p2476_p0 = pneg %p2475_p13 }
 0x3be   : > { %v1879_v31 = vrot.slane %v1878_v13, 1  ;;  %v1947_v24 = vadd.f32 %v1946_v38, %v1945_v37  ;;  %p2482_p1 = por %p2481_p9, %p2480_p5 }
 0x3c0   : > { %v1948_v50 = vrot.slane %v1947_v24, 1  ;;  %v1880_v10 = vadd.f32 %v1879_v31, %v1878_v13  ;;  %p2483_p2 = pnand %p2482_p1, %p2476_p0 }
 0x3c2   : > { %v1949_v7 = vadd.f32 %v1948_v50, %v1947_v24 }
 0x3c4   : > { %v1951_v41 = vsel %vm1950_vm10, %v1880_v10, %v1949_v7 }
 0x3c5   : > { %1952 = vst [vmem:[%s230_s20] sm:$0x3] %v1951_v41 }
 0x3c6   : > { %2486 = shalt.err (!%p2483_p2)
}
 0x3c7   : > { %s2487_s25 = scalar_lea.hbm %s4110_s24, 32  ;;  %s2491_s30 = scalar_lea.hbm %s4162_s3, 64 }
 0x3c8   : > { %p2488_p3 = scmp.ne.s32.totalorder %s4110_s24, %s2487_s25  ;;  %p2492_p4 = scmp.lt.u32.totalorder %s4110_s24, %s4162_s3 }
 0x3c9   : > { %p2493_p6 = scmp.lt.u32.totalorder %s2491_s30, %s2487_s25  ;;  %p2495_p12 = scmp.lt.u32.totalorder %s2487_s25, %s4110_s24 }
 0x3ca   : > { %p2489_p7 = pnand %p2488_p3, %p2695_p10 }
 0x3cb   : > { %p2494_p8 = por %p2493_p6, %p2492_p4 }
 0x3cc   : > { %p2490_p11 = pneg %p2489_p7 }
 0x3cd   : > { %p2496_p13 = por %p2495_p12, %p2494_p8 }
 0x3cf   : > { %p2497_p0 = pnand %p2496_p13, %p2490_p11 }
 0x3d1   : > { %2500 = shalt.err (!%p2497_p0)
}
 0x3d2   : > { %2288 = dma.vmem_to_hbm [thread:$0]  (%p2695_p10), %s4112_s27, 32, %s4110_s24, %s1959_s10  }
 0x3d3 PF: > { %s2004_s26 = sand.u32 1, %s2543_s12   ;;  %p4298_p5 = scmp.ne.s32.totalorder %s4207_s23, 0 }
 0x3d4   : > { %p4299_p9 = scmp.ge.s32.totalorder %s2563_s17, 2  ;;  %s2005_s22 = scalar_lea.sflag [#allocation4], %s2004_s26 }
 0x3d6   : > { %p2300_p1 = pnand %p4299_p9, %p4298_p5 }
 0x3d8   : > { %2534 = dma.done.wait (!%p2300_p1), %s2005_s22, 4096  }
 0x3d9   : > { %2536 = vsyncadd (!%p2300_p1), %s2005_s22, 4294963200  ;;  %s2014_s20 = scalar_lea.sflag [#allocation9], %s2004_s26 }
 0x3da   : > { %2538 = dma.done.wait (!%p2300_p1), %s2014_s20, 32  }
 0x3db   : > { %2540 = vsyncadd (!%p2300_p1), %s2014_s20, 4294967264  ;;  %s24_s17 = sadd.s32 1, %s2563_s17   ;;  %s4300_s12 = smov %s2547_s13 }
 0x3dc   : > { %p21_p2 = scmp.ge.s32.totalorder %s24_s17, 4   ;;  %s4301_s13 = smov %s2551_s14 }
 0x3dd   : > { %s4302_s14 = smov %s2704_s5  ;;  %s4303_s15 = smov %s2559_s16 }
 0x3de   : > { %s4304_s16 = smov %s4306_s28  ;;  %23 = sbr.rel (!%p21_p2) target bundleno = 9 (0x9), region = 95 }
 0x3e5   :  { %2019 = vsyncpa [#allocation3], 1 }
 0x3e6   :  { %2021 = vsyncpa [#allocation3 + $0x1], 1 }
 0x3e7   :  { %2022 = vsyncpa [#allocation6], 1 }
 0x3e8   :  { %2023 = vsyncpa [#allocation4], 1 }
 0x3e9   :  { %2025 = vsyncpa [#allocation4 + $0x1], 1 }
 0x3ea   :  { %2026 = vsyncpa [#allocation9], 1 }
 0x3eb   :  { %2028 = vsyncpa [#allocation9 + $0x1], 1 }

</bundles_post_ra>
